<compile_context>
chip_gen: v7x
topology: tpu7x:2x2x1
jax: 0.10.0
libtpu: 0.0.40
codegen_flags: <defaults>
</compile_context>

<pallas_src>
import functools

import jax
import jax.numpy as jnp
from jax.experimental import pallas as pl
from jax.experimental.pallas import tpu as pltpu


_LANE = 128
_MIN_GRID_STEPS = 4   # keep the pipeline (and v7x's second core) busy


def _round_up(x, m):
    return ((x + m - 1) // m) * m


def _vmem_budgets():
    """Generation-aware (scoped VMEM limit, per-kernel buffer budget) in bytes."""
    vmem_cap = None
    try:
        info = pltpu.get_tpu_info()
        vmem_cap = getattr(info, "vmem_capacity_bytes", None)
    except Exception:
        vmem_cap = None
    if vmem_cap is None:
        vmem_cap = 64 * 1024 * 1024  # conservative: assume a 64 MiB/TC part (v7x-class)
    if vmem_cap >= 100 * 1024 * 1024:      # 128 MiB parts: v5e / v6e
        return 96 * 1024 * 1024, 64 * 1024 * 1024
    return 48 * 1024 * 1024, 24 * 1024 * 1024   # 64 MiB parts: v7x


def _choose_block_rows(rows, row_width, in_itemsize, out_itemsize, budget):
    """Largest multiple-of-8 row tile whose footprint (double-buffered I/O plus
    the f32 compute temporaries) fits the budget, while keeping the grid at
    least _MIN_GRID_STEPS long."""
    # 2x double-buffered input + 2x double-buffered output + ~3 f32 temps
    # (x, centered, y) that the kernel materializes per element.
    per_row = (2 * in_itemsize + 2 * out_itemsize) * row_width + 3 * 4 * row_width
    br = budget // max(per_row, 1)
    # Keep >= _MIN_GRID_STEPS grid steps so prologue/epilogue DMA overlaps with
    # compute and megacore can split the "parallel" axis.
    br = min(br, _round_up(-(-rows // _MIN_GRID_STEPS), 8))
    br = min(br, _round_up(rows, 8))
    br = max(8, (br // 8) * 8)
    return int(br)


def _layernorm_kernel(x_ref, gamma_ref, beta_ref, o_ref, *, eps, d_model,
                      approx_reciprocal):
    # x_ref: (block_rows, d_model); gamma/beta: (1, d_model), already f32.
    # Rows in a partial last block are OOB garbage, but stats are per-row and the
    # OOB stores are masked, so they never contaminate real rows.
    x = x_ref[...].astype(jnp.float32)
    mean = jnp.mean(x, axis=-1, keepdims=True)
    centered = x - mean
    # PyTorch x.std(dim=-1) is the UNBIASED std (divides by N-1); eps is added
    # to std (not variance) — reproduce that exactly.
    var_unbiased = jnp.sum(centered * centered, axis=-1, keepdims=True) / (d_model - 1)
    std = jnp.sqrt(var_unbiased)
    inv = pl.reciprocal(std + eps, approx=approx_reciprocal)
    y = gamma_ref[...] * (centered * inv) + beta_ref[...]
    o_ref[...] = y.astype(o_ref.dtype)
    # TODO(synk): on v7x (compute-bound at 3.2 TB/s HBM) switch to fused
    # single-pass sum/sumsq stats (compensated form) and a bf16 normalize path
    # for bf16 inputs; neutral on HBM-bound v5e/v6e so not done here.


def _layernorm_packed_kernel(x_ref, gamma_ref, beta_ref, seg_ref, segT_ref, o_ref, *,
                             eps, d_model, approx_reciprocal):
    # x_ref: (block_rows, D) with D = k*d_model = 128: k logical rows packed along
    # the lane axis so HBM loads/stores are lane-dense (no masked partial stores).
    # seg_ref: (D, 128) one-hot "element -> segment" matrix, segT_ref = seg.T.
    # Per-segment reduce + broadcast are two tiny MXU matmuls each; everything
    # stays 2-D (no in-kernel reshape/relayout) and per-row independent.
    x = x_ref[...].astype(jnp.float32)
    seg = seg_ref[...]
    segT = segT_ref[...]
    hi = jax.lax.Precision.HIGHEST
    seg_sum = jnp.dot(x, seg, preferred_element_type=jnp.float32, precision=hi)
    mean = jnp.dot(seg_sum, segT, preferred_element_type=jnp.float32,
                   precision=hi) / d_model
    centered = x - mean
    sq_sum = jnp.dot(centered * centered, seg, preferred_element_type=jnp.float32,
                     precision=hi)
    var_unbiased = jnp.dot(sq_sum, segT, preferred_element_type=jnp.float32,
                           precision=hi) / (d_model - 1)
    std = jnp.sqrt(var_unbiased)
    inv = pl.reciprocal(std + eps, approx=approx_reciprocal)
    y = gamma_ref[...] * (centered * inv) + beta_ref[...]
    o_ref[...] = y.astype(o_ref.dtype)


def layer_normalization(x, gamma, beta, *, eps=1e-6, block_rows=None,
                        approx_reciprocal=False):
    """gamma * (x - mean) / (std + eps) + beta over the last axis
    (unbiased std, eps added to std — matching the hand-rolled PyTorch module)."""
    orig_shape = x.shape
    d_model = orig_shape[-1]
    assert d_model > 1, "d_model must be > 1 (unbiased std divides by N-1)"

    rows = 1
    for s in orig_shape[:-1]:
        rows *= s
    x2 = x.reshape(rows, d_model)
    # Pre-cast params once in the wrapper (their blocks are grid-invariant, so
    # this avoids a per-grid-step cast inside the kernel).
    gamma32 = gamma.astype(jnp.float32).reshape(1, d_model)
    beta32 = beta.astype(jnp.float32).reshape(1, d_model)

    vmem_limit, budget = _vmem_budgets()
    itemsize = x.dtype.itemsize

    pack = (d_model < _LANE) and (_LANE % d_model == 0)
    if pack:
        k = _LANE // d_model
        width = _LANE
        rows_pad = _round_up(rows, k)
        if rows_pad != rows:
            x2 = jnp.pad(x2, ((0, rows_pad - rows), (0, 0)))
        n_rows = rows_pad // k
        x_in = x2.reshape(n_rows, width)
        gamma_in = jnp.tile(gamma32, (1, k))
        beta_in = jnp.tile(beta32, (1, k))
        seg = (jnp.arange(width)[:, None] // d_model
               == jnp.arange(_LANE)[None, :]).astype(jnp.float32)   # (D, 128)
        segT = seg.T                                                 # (128, D)
    else:
        # TODO(synk): d_model < 128 that does not divide 128 still takes the
        # masked-store path; pad the lane axis per row if that shape ever matters.
        x_in = x2
        gamma_in, beta_in = gamma32, beta32
        n_rows, width = rows, d_model

    if block_rows is None:
        block_rows = _choose_block_rows(n_rows, width, itemsize, itemsize, budget)

    grid = (pl.cdiv(n_rows, block_rows),)

    if pack:
        kernel = functools.partial(
            _layernorm_packed_kernel, eps=eps, d_model=d_model,
            approx_reciprocal=approx_reciprocal)
        in_specs = [
            pl.BlockSpec((block_rows, width), lambda i: (i, 0)),
            pl.BlockSpec((1, width), lambda i: (0, 0)),
            pl.BlockSpec((1, width), lambda i: (0, 0)),
            pl.BlockSpec((width, _LANE), lambda i: (0, 0)),
            pl.BlockSpec((_LANE, width), lambda i: (0, 0)),
        ]
        args = (x_in, gamma_in, beta_in, seg, segT)
    else:
        kernel = functools.partial(
            _layernorm_kernel, eps=eps, d_model=d_model,
            approx_reciprocal=approx_reciprocal)
        in_specs = [
            pl.BlockSpec((block_rows, width), lambda i: (i, 0)),
            pl.BlockSpec((1, width), lambda i: (0, 0)),
            pl.BlockSpec((1, width), lambda i: (0, 0)),
        ]
        args = (x_in, gamma_in, beta_in)

    out = pl.pallas_call(
        kernel,
        out_shape=jax.ShapeDtypeStruct((n_rows, width), x.dtype),
        grid_spec=pltpu.PrefetchScalarGridSpec(
            num_scalar_prefetch=0,
            grid=grid,
            in_specs=in_specs,
            out_specs=pl.BlockSpec((block_rows, width), lambda i: (i, 0)),
        ),
        compiler_params=pltpu.CompilerParams(
            dimension_semantics=("parallel",),
            vmem_limit_bytes=vmem_limit,
        ),
    )(*args)

    if pack:
        out = out.reshape(-1, d_model)[:rows]
    return out.reshape(orig_shape)


if __name__ == "__main__":
    eps = 1e-6
    key = jax.random.PRNGKey(0)
    k1, k2 = jax.random.split(key)

    def reference(x, gamma, beta):
        d = x.shape[-1]
        mean = jnp.mean(x, axis=-1, keepdims=True)
        std = jnp.sqrt(jnp.sum((x - mean) ** 2, axis=-1, keepdims=True) / (d - 1))
        return gamma * (x - mean) / (std + eps) + beta

    # Small-hidden test shape (exercises the lane-packed path).
    batch, seq, d_model = 2, 8, 32
    x = jax.random.normal(k1, (batch, seq, d_model), dtype=jnp.float32)
    gamma = jnp.ones((d_model,), dtype=jnp.float32)   # matches nn.Parameter(torch.ones)
    beta = jnp.zeros((d_model,), dtype=jnp.float32)   # matches nn.Parameter(torch.zeros)
    y = jax.block_until_ready(layer_normalization(x, gamma, beta, eps=eps))
    assert jnp.allclose(y, reference(x, gamma, beta), atol=1e-4, rtol=1e-4), \
        "mismatch vs reference (packed path)"

    # d_model >= 128 (plain lane-dense path).
    d2 = 256
    x_big = jax.random.normal(k2, (batch, seq, d2), dtype=jnp.float32)
    g2 = jnp.ones((d2,), dtype=jnp.float32)
    b2 = jnp.zeros((d2,), dtype=jnp.float32)
    y2 = jax.block_until_ready(layer_normalization(x_big, g2, b2, eps=eps))
    assert jnp.allclose(y2, reference(x_big, g2, b2), atol=1e-4, rtol=1e-4), \
        "mismatch vs reference (unpacked path)"

    print("KERNEL_OK")
</pallas_src>

<mosaic_0001>
module attributes {stable_mosaic.version = 11 : i64} {
  func.func @_layernorm_packed_kernel(%arg0: i32, %arg1: memref<8x128xf32, #tpu.memory_space<vmem>>, %arg2: memref<1x128xf32, #tpu.memory_space<vmem>>, %arg3: memref<1x128xf32, #tpu.memory_space<vmem>>, %arg4: memref<128x128xf32, #tpu.memory_space<vmem>>, %arg5: memref<128x128xf32, #tpu.memory_space<vmem>>, %arg6: memref<8x128xf32, #tpu.memory_space<vmem>>) attributes {dimension_semantics = [#tpu.dimension_semantics<parallel>], iteration_bounds = array<i64: 1>, scalar_prefetch = 0 : i64, scratch_operands = 0 : i64, tpu.core_type = #tpu.core_type<tc>, window_params = [{transform_indices = @transform_0, window_bounds = array<i64: 8, 128>}, {pipeline_mode = #tpu.pipeline_mode<synchronous>, transform_indices = @transform_1, window_bounds = array<i64: 1, 128>}, {pipeline_mode = #tpu.pipeline_mode<synchronous>, transform_indices = @transform_2, window_bounds = array<i64: 1, 128>}, {pipeline_mode = #tpu.pipeline_mode<synchronous>, transform_indices = @transform_3, window_bounds = array<i64: 128, 128>}, {pipeline_mode = #tpu.pipeline_mode<synchronous>, transform_indices = @transform_4, window_bounds = array<i64: 128, 128>}, {transform_indices = @transform_5, window_bounds = array<i64: 8, 128>}]} {
    %c0 = arith.constant 0 : index
    %c0_0 = arith.constant 0 : index
    %0 = vector.load %arg1[%c0, %c0_0] : memref<8x128xf32, #tpu.memory_space<vmem>>, vector<8x128xf32>
    %c0_1 = arith.constant 0 : index
    %c0_2 = arith.constant 0 : index
    %1 = vector.load %arg4[%c0_1, %c0_2] : memref<128x128xf32, #tpu.memory_space<vmem>>, vector<128x128xf32>
    %c0_3 = arith.constant 0 : index
    %c0_4 = arith.constant 0 : index
    %2 = vector.load %arg5[%c0_3, %c0_4] : memref<128x128xf32, #tpu.memory_space<vmem>>, vector<128x128xf32>
    %cst = arith.constant dense<0.000000e+00> : vector<8x128xf32>
    %3 = tpu.matmul %0, %1, %cst {dimension_numbers = #tpu.dot_dimension_numbers<[1], [0], [0], [1], [0, 0, 1, 1], [], []>, precision = #tpu.contract_precision<fp32>} : vector<8x128xf32>, vector<128x128xf32>, vector<8x128xf32> -> vector<8x128xf32>
    %cst_5 = arith.constant dense<0.000000e+00> : vector<8x128xf32>
    %4 = tpu.matmul %3, %2, %cst_5 {dimension_numbers = #tpu.dot_dimension_numbers<[1], [0], [0], [1], [0, 0, 1, 1], [], []>, precision = #tpu.contract_precision<fp32>} : vector<8x128xf32>, vector<128x128xf32>, vector<8x128xf32> -> vector<8x128xf32>
    %cst_6 = arith.constant 3.200000e+01 : f32
    %5 = vector.broadcast %cst_6 : f32 to vector<8x128xf32>
    %6 = arith.divf %4, %5 : vector<8x128xf32>
    %7 = arith.subf %0, %6 : vector<8x128xf32>
    %8 = arith.mulf %7, %7 : vector<8x128xf32>
    %cst_7 = arith.constant dense<0.000000e+00> : vector<8x128xf32>
    %9 = tpu.matmul %8, %1, %cst_7 {dimension_numbers = #tpu.dot_dimension_numbers<[1], [0], [0], [1], [0, 0, 1, 1], [], []>, precision = #tpu.contract_precision<fp32>} : vector<8x128xf32>, vector<128x128xf32>, vector<8x128xf32> -> vector<8x128xf32>
    %cst_8 = arith.constant dense<0.000000e+00> : vector<8x128xf32>
    %10 = tpu.matmul %9, %2, %cst_8 {dimension_numbers = #tpu.dot_dimension_numbers<[1], [0], [0], [1], [0, 0, 1, 1], [], []>, precision = #tpu.contract_precision<fp32>} : vector<8x128xf32>, vector<128x128xf32>, vector<8x128xf32> -> vector<8x128xf32>
    %cst_9 = arith.constant 3.100000e+01 : f32
    %11 = vector.broadcast %cst_9 : f32 to vector<8x128xf32>
    %12 = arith.divf %10, %11 : vector<8x128xf32>
    %13 = math.sqrt %12 : vector<8x128xf32>
    %cst_10 = arith.constant 9.99999997E-7 : f32
    %14 = vector.broadcast %cst_10 : f32 to vector<8x128xf32>
    %15 = arith.addf %13, %14 : vector<8x128xf32>
    %16 = tpu.reciprocal %15 : vector<8x128xf32> -> vector<8x128xf32>
    %c0_11 = arith.constant 0 : index
    %c0_12 = arith.constant 0 : index
    %17 = vector.load %arg2[%c0_11, %c0_12] : memref<1x128xf32, #tpu.memory_space<vmem>>, vector<1x128xf32>
    %18 = arith.mulf %7, %16 : vector<8x128xf32>
    %19 = vector.broadcast %17 : vector<1x128xf32> to vector<8x128xf32>
    %20 = arith.mulf %19, %18 : vector<8x128xf32>
    %c0_13 = arith.constant 0 : index
    %c0_14 = arith.constant 0 : index
    %21 = vector.load %arg3[%c0_13, %c0_14] : memref<1x128xf32, #tpu.memory_space<vmem>>, vector<1x128xf32>
    %22 = vector.broadcast %21 : vector<1x128xf32> to vector<8x128xf32>
    %23 = arith.addf %20, %22 : vector<8x128xf32>
    %c0_15 = arith.constant 0 : index
    %c0_16 = arith.constant 0 : index
    %24 = vector.load %arg6[%c0_15, %c0_16] : memref<8x128xf32, #tpu.memory_space<vmem>>, vector<8x128xf32>
    tpu.vector_store %arg6[%c0_15, %c0_16], %23 {strides = array<i32>} : memref<8x128xf32, #tpu.memory_space<vmem>>, vector<8x128xf32>,
    return
  }
  func.func @transform_0(%arg0: i32) -> (i32, i32) {
    %c0_i32 = arith.constant 0 : i32
    %c0_i32_0 = arith.constant 0 : i32
    return %arg0, %c0_i32 : i32, i32
  }
  func.func @transform_1(%arg0: i32) -> (i32, i32) {
    %c0_i32 = arith.constant 0 : i32
    %c0_i32_0 = arith.constant 0 : i32
    %c0_i32_1 = arith.constant 0 : i32
    return %c0_i32, %c0_i32_0 : i32, i32
  }
  func.func @transform_2(%arg0: i32) -> (i32, i32) {
    %c0_i32 = arith.constant 0 : i32
    %c0_i32_0 = arith.constant 0 : i32
    %c0_i32_1 = arith.constant 0 : i32
    return %c0_i32, %c0_i32_0 : i32, i32
  }
  func.func @transform_3(%arg0: i32) -> (i32, i32) {
    %c0_i32 = arith.constant 0 : i32
    %c0_i32_0 = arith.constant 0 : i32
    %c0_i32_1 = arith.constant 0 : i32
    return %c0_i32, %c0_i32_0 : i32, i32
  }
  func.func @transform_4(%arg0: i32) -> (i32, i32) {
    %c0_i32 = arith.constant 0 : i32
    %c0_i32_0 = arith.constant 0 : i32
    %c0_i32_1 = arith.constant 0 : i32
    return %c0_i32, %c0_i32_0 : i32, i32
  }
  func.func @transform_5(%arg0: i32) -> (i32, i32) {
    %c0_i32 = arith.constant 0 : i32
    %c0_i32_0 = arith.constant 0 : i32
    return %arg0, %c0_i32 : i32, i32
  }
}

</mosaic_0001>

<bundles_post_ra>
// kernel: tpu_custom_call.1
= control target key start
LH: loop header
LB: loop body
LE: loop exit
PB: predicated region body
PF: predicated region fallthrough
CT: control target
= control target key end

     0   :  { %10 = vsyncpa [#allocation3], 0  ;;  %s5724_s0 = inlined_call_operand.hbm [shape: f32[4,128], index: 0, kind: input, shape index: {}]   ;;  %s5725_s1 = inlined_call_operand.vmem [shape: f32[1,128], index: 1, kind: input, shape index: {}]   ;;  %s5726_s2 = inlined_call_operand.vmem [shape: f32[1,128], index: 2, kind: input, shape index: {}]   ;;  %s5727_s3 = inlined_call_operand.hbm [shape: f32[128,128], index: 3, kind: input, shape index: {}]   ;;  %s5728_s4 = inlined_call_operand.hbm [shape: f32[128,128], index: 4, kind: input, shape index: {}]   ;;  %s5729_s5 = inlined_call_operand.hbm [shape: f32[4,128], index: 5, kind: output, shape index: {}]  }
   0x1   :  { %11 = vsyncpa [#allocation6], 0 }
   0x2   :  { %12 = vsyncpa [#allocation4], 0 }
   0x3   :  { %17 = vsyncadd [#allocation3], 64  ;;  %s4685_s18 = smov [#allocation5]   ;;  %s4591_s22 = scalar_lea.hbm %s5727_s3, 2048 }
   0x4   :  { %s34_s19 = sshll.u32 %s4685_s18, 4  ;;  %p4592_p0 = scmp.ne.s32.totalorder %s5727_s3, %s4591_s22  ;;  %s35_s19 = int_to_ptr.vmem [resolvable:$true] %s34_s19 }
   0x5   :  { %p4595_p1 = scmp.lt.u32.totalorder %s4591_s22, %s5727_s3 }
   0x7   :  { %p4597_p2 = pnand %p4595_p1, %p4592_p0 }
   0x9   :  { %4600 = shalt.err (!%p4597_p2)
}
   0xa   :  { %s4601_s27 = scalar_lea.vmem %s35_s19, 2048  ;;  %p4606_p4 = scmp.lt.s32.totalorder %s35_s19, %s35_s19 }
   0xb   :  { %p4602_p3 = scmp.ne.s32.totalorder %s35_s19, %s4601_s27  ;;  %p4607_p5 = scmp.lt.s32.totalorder %s4601_s27, %s4601_s27 }
   0xd   :  { %p4608_p6 = por %p4607_p5, %p4606_p4 }
   0xf   :  { %p4609_p7 = pnand %p4608_p6, %p4602_p3 }
  0x11   :  { %4612 = shalt.err (!%p4609_p7)
}
  0x12   :  { %s4686_s28 = smov 128   ;;  %s4687_s29 = smov 8  }
  0x13   :  { %40 = dma.hbm_to_vmem [thread:$0]  %s5727_s3, 2048, %s35_s19, [#allocation6], %s4686_s28, %s4686_s28, %s4687_s29  }
  0x14   :  { %s4688_s7 = smov [#allocation2]   ;;  %s4613_s11 = scalar_lea.hbm %s5724_s0, 64 }
  0x15   :  { %s18_s8 = sshll.u32 %s4688_s7, 4  ;;  %p4614_p8 = scmp.ne.s32.totalorder %s5724_s0, %s4613_s11  ;;  %s19_s8 = int_to_ptr.vmem [resolvable:$true] %s18_s8 }
  0x16   :  { %p4617_p9 = scmp.lt.u32.totalorder %s4613_s11, %s5724_s0 }
  0x18   :  { %p4619_p10 = pnand %p4617_p9, %p4614_p8 }
  0x1a   :  { %4622 = shalt.err (!%p4619_p10)
}
  0x1b   :  { %s4623_s16 = scalar_lea.vmem %s19_s8, 64  ;;  %s4627_s3 = scalar_lea.vmem %s19_s8, 128 }
  0x1c   :  { %p4624_p11 = scmp.ne.s32.totalorder %s19_s8, %s4623_s16  ;;  %p4628_p12 = scmp.lt.s32.totalorder %s19_s8, %s19_s8 }
  0x1d   :  { %p4629_p13 = scmp.lt.s32.totalorder %s4627_s3, %s4623_s16 }
  0x1f   :  { %p4630_p0 = por %p4629_p13, %p4628_p12 }
  0x21   :  { %p4631_p1 = pnand %p4630_p0, %p4624_p11 }
  0x23   :  { %4634 = shalt.err (!%p4631_p1)
}
  0x24   :  { %s4689_s17 = smov 64   ;;  %s4690_s18 = smov 4  }
  0x25   :  { %24 = dma.hbm_to_vmem [thread:$0]  %s5724_s0, 64, %s19_s8, [#allocation3], %s4689_s17, %s4689_s17, %s4690_s18  }
  0x26   :  { %s4691_s21 = smov [#allocation7]   ;;  %s4635_s25 = scalar_lea.hbm %s5728_s4, 2048 }
  0x27   :  { %s46_s22 = sshll.u32 %s4691_s21, 4  ;;  %p4636_p2 = scmp.ne.s32.totalorder %s5728_s4, %s4635_s25  ;;  %s47_s22 = int_to_ptr.vmem [resolvable:$true] %s46_s22 }
  0x28   :  { %p4639_p3 = scmp.lt.u32.totalorder %s4635_s25, %s5728_s4 }
  0x2a   :  { %p4641_p4 = pnand %p4639_p3, %p4636_p2 }
  0x2c   :  { %4644 = shalt.err (!%p4641_p4)
}
  0x2d   :  { %s4645_s7 = scalar_lea.vmem %s47_s22, 2048  ;;  %p4650_p6 = scmp.lt.s32.totalorder %s47_s22, %s47_s22 }
  0x2e   :  { %p4646_p5 = scmp.ne.s32.totalorder %s47_s22, %s4645_s7  ;;  %p4651_p7 = scmp.lt.s32.totalorder %s4645_s7, %s4645_s7 }
  0x30   :  { %p4652_p8 = por %p4651_p7, %p4650_p6 }
  0x32   :  { %p4653_p9 = pnand %p4652_p8, %p4646_p5 }
  0x34   :  { %4656 = shalt.err (!%p4653_p9)
}
  0x35   :  { %52 = dma.hbm_to_vmem [thread:$0]  %s5728_s4, 2048, %s47_s22, [#allocation6], %s4686_s28, %s4686_s28, %s4687_s29  }
  0x36   :  { %4679 = dma.done.wait [#allocation3], 128  }
  0x37   :  { %4680 = vsyncadd [#allocation3], 4294967168 }
  0x38   :  { %4681 = dma.done.wait [#allocation6], 4096  }
  0x39   :  { %4682 = vsyncadd [#allocation6], 4294963200  ;;  %v5749_v0 = vmov 0.0|0.0   ;;  %vm4693_vm0 = vmmov 0   ;;  %v5738_v1 = vmov 0.0   ;;  %v63_v2 = vld [vmem:[#allocation5] sm:$0xff] }
  0x3a   :  { %3960 = vmatprep.subr.bf16.mxu0 %v5749_v0  ;;  %3152 = vmatprep.mubr.msk.f32.mxu0 %vm4693_vm0, %v5738_v1  ;;  %v64_v3 = vld [vmem:[#allocation5 + $0x8] sm:$0xff]  ;;  %v65_v4 = vld [vmem:[#allocation5 + $0x10] sm:$0xff]  ;;  %v96_v5 = vand.u32 4294901760, %v63_v2  ;;  %v66_v7 = vld [vmem:[#allocation5 + $0x18] sm:$0xff] }
  0x3b   :  { %4104 = vmatprep.subr.bf16.mxu1 %v5749_v0  ;;  %3362 = vmatprep.mubr.msk.f32.mxu1 %vm4693_vm0, %v5738_v1  ;;  %v99_v6 = vand.u32 4294901760, %v64_v3  ;;  %v102_v8 = vand.u32 4294901760, %v65_v4  ;;  %v105_v9 = vand.u32 4294901760, %v66_v7  ;;  %v67_v10 = vld [vmem:[#allocation5 + $0x20] sm:$0xff]  ;;  %v68_v11 = vld [vmem:[#allocation5 + $0x28] sm:$0xff]  ;;  %v69_v16 = vld [vmem:[#allocation5 + $0x30] sm:$0xff] }
  0x3c   :  { %v108_v14 = vand.u32 4294901760, %v67_v10  ;;  %v111_v15 = vand.u32 4294901760, %v68_v11  ;;  %v70_v17 = vld [vmem:[#allocation5 + $0x38] sm:$0xff]  ;;  %v114_v19 = vand.u32 4294901760, %v69_v16  ;;  %v71_v21 = vld [vmem:[#allocation5 + $0x40] sm:$0xff]  ;;  %v72_v23 = vld [vmem:[#allocation5 + $0x48] sm:$0xff]  ;;  %v4795_v34 = vsub.f32 %v63_v2, %v96_v5 }
  0x3d   :  { %v4777_v12 = vpack.c.bf16 %v99_v6, %v96_v5  ;;  %v4780_v13 = vpack.c.bf16 %v105_v9, %v102_v8  ;;  %v117_v20 = vand.u32 4294901760, %v70_v17  ;;  %v4786_v22 = vld [vmem:[#allocation2] sm:$0xff]  ;;  %v73_v24 = vld [vmem:[#allocation5 + $0x50] sm:$0xff]  ;;  %v75_v26 = vld [vmem:[#allocation5 + $0x60] sm:$0xff]  ;;  %v120_v27 = vand.u32 4294901760, %v71_v21 }
  0x3e   :  { %v4784_v18 = vpack.c.bf16 %v111_v15, %v108_v14  ;;  %v74_v25 = vld [vmem:[#allocation5 + $0x58] sm:$0xff]  ;;  %v76_v28 = vld [vmem:[#allocation5 + $0x68] sm:$0xff]  ;;  %v77_v29 = vld [vmem:[#allocation5 + $0x70] sm:$0xff]  ;;  %v4790_v31 = vand.u32 4294901760, %v4786_v22  ;;  %v123_v33 = vand.u32 4294901760, %v72_v23  ;;  %v4797_v35 = vsub.f32 %v64_v3, %v99_v6 }
  0x3f   :  { %5785 = vst [vmem:[#allocation12_spill] sm:$0xff] %v4777_v12  ;;  %3962 = vmatpush3.bf16.msra.mxu0 %v4777_v12  ;;  %5786 = vst [vmem:[#allocation13_spill] sm:$0xff] %v4780_v13  ;;  %v78_v30 = vld [vmem:[#allocation5 + $0x78] sm:$0xff]  ;;  %v4793_v32 = vpack.c.bf16 %v117_v20, %v114_v19  ;;  %v126_v36 = vand.u32 4294901760, %v73_v24  ;;  %v129_v37 = vand.u32 4294901760, %v74_v25  ;;  %v132_v38 = vand.u32 4294901760, %v75_v26 }
  0x40   :  { %3963 = vmatprep.subr.bf16.mxu0 %v5749_v0  ;;  %5787 = vst [vmem:[#allocation14_spill] sm:$0xff] %v4784_v18  ;;  %v135_v39 = vand.u32 4294901760, %v76_v28  ;;  %v138_v40 = vand.u32 4294901760, %v77_v29  ;;  %v141_v41 = vand.u32 4294901760, %v78_v30  ;;  %v4802_v42 = vsub.f32 %v4786_v22, %v4790_v31 }
  0x41   :  { %5788 = vst [vmem:[#allocation15_spill] sm:$0xff] %v4793_v32  ;;  %v4804_v43 = vsub.f32 %v65_v4, %v102_v8  ;;  %v4806_v44 = vsub.f32 %v66_v7, %v105_v9  ;;  %v4809_v45 = vpack.c.bf16 %v123_v33, %v120_v27  ;;  %v189_v46 = vand.u32 4294901760, %v4795_v34 }
  0x42   :  { %v196_v47 = vand.u32 4294901760, %v4797_v35  ;;  %v4813_v48 = vsub.f32 %v67_v10, %v108_v14  ;;  %v4816_v49 = vpack.c.bf16 %v129_v37, %v126_v36  ;;  %v4818_v50 = vpack.c.bf16 %v135_v39, %v132_v38 }
  0x43   :  { %3965 = vmatpush3.bf16.msra.mxu0 %v4780_v13  ;;  %5789 = vst [vmem:[#allocation16_spill] sm:$0xff] %v4809_v45  ;;  %v4820_v51 = vpack.c.bf16 %v141_v41, %v138_v40  ;;  %v178_v52 = vand.u32 4294901760, %v4802_v42  ;;  %v203_v53 = vand.u32 4294901760, %v4804_v43  ;;  %v210_v54 = vand.u32 4294901760, %v4806_v44 }
  0x44   :  { %3966 = vmatprep.subr.bf16.mxu0 %v5749_v0  ;;  %5790 = vst [vmem:[#allocation17_spill] sm:$0xff] %v4816_v49  ;;  %5791 = vst [vmem:[#allocation18_spill] sm:$0xff] %v4818_v50  ;;  %v4825_v55 = vsub.f32 %v68_v11, %v111_v15  ;;  %v190_v56 = vsub.f32 %v4795_v34, %v189_v46  ;;  %v197_v57 = vsub.f32 %v4797_v35, %v196_v47 }
  0x45   :  { %5792 = vst [vmem:[#allocation19_spill] sm:$0xff] %v4820_v51  ;;  %v217_v58 = vand.u32 4294901760, %v4813_v48  ;;  %v4831_v59 = vsub.f32 %v69_v16, %v114_v19  ;;  %v4834_v60 = vsub.f32 %v70_v17, %v117_v20  ;;  %v4836_v61 = vsub.f32 %v71_v21, %v120_v27 }
  0x46   :  { %v4838_v62 = vsub.f32 %v72_v23, %v123_v33  ;;  %v4840_v63 = vsub.f32 %v73_v24, %v126_v36  ;;  %v4842_v2 = vsub.f32 %v74_v25, %v129_v37  ;;  %v4844_v3 = vsub.f32 %v75_v26, %v132_v38 }
  0x47   :  { %3968 = vmatpush3.bf16.msra.mxu0 %v4784_v18  ;;  %v4846_v4 = vsub.f32 %v76_v28, %v135_v39  ;;  %v4848_v5 = vsub.f32 %v77_v29, %v138_v40  ;;  %v179_v6 = vsub.f32 %v4802_v42, %v178_v52  ;;  %v204_v7 = vsub.f32 %v4804_v43, %v203_v53 }
  0x48   :  { %3969 = vmatprep.subr.bf16.mxu0 %v5749_v0  ;;  %v224_v8 = vand.u32 4294901760, %v4825_v55  ;;  %v4855_v9 = vsub.f32 %v78_v30, %v141_v41  ;;  %v191_v10 = vand.u32 4294901760, %v190_v56  ;;  %v198_v11 = vand.u32 4294901760, %v197_v57 }
  0x49   :  { %v211_v14 = vsub.f32 %v4806_v44, %v210_v54  ;;  %v231_v15 = vand.u32 4294901760, %v4831_v59  ;;  %v238_v16 = vand.u32 4294901760, %v4834_v60  ;;  %v245_v17 = vand.u32 4294901760, %v4836_v61 }
  0x4a   :  { %v252_v19 = vand.u32 4294901760, %v4838_v62  ;;  %v259_v20 = vand.u32 4294901760, %v4840_v63  ;;  %v266_v21 = vand.u32 4294901760, %v4842_v2  ;;  %v273_v23 = vand.u32 4294901760, %v4844_v3 }
  0x4b   :  { %3971 = vmatpush3.bf16.msra.mxu0 %v4793_v32  ;;  %v280_v24 = vand.u32 4294901760, %v4846_v4  ;;  %v287_v25 = vand.u32 4294901760, %v4848_v5  ;;  %v294_v26 = vand.u32 4294901760, %v4855_v9  ;;  %v4870_v27 = vpack.c.bf16 %v196_v47, %v189_v46 }
  0x4c   :  { %3972 = vmatprep.subr.bf16.mxu0 %v5749_v0  ;;  %v4872_v28 = vpack.c.bf16 %v210_v54, %v203_v53  ;;  %v4874_v29 = vpack.c.bf16 %v224_v8, %v217_v58  ;;  %v4877_v30 = vpack.c.bf16 %v238_v16, %v231_v15  ;;  %v4879_v33 = vpack.c.bf16 %v252_v19, %v245_v17 }
  0x4d   :  { %5793 = vst [vmem:[#allocation20_spill] sm:$0xff] %v4870_v27  ;;  %v4881_v36 = vpack.c.bf16 %v266_v21, %v259_v20  ;;  %v4883_v37 = vpack.c.bf16 %v280_v24, %v273_v23  ;;  %v4886_v38 = vpack.c.bf16 %v294_v26, %v287_v25  ;;  %v180_v39 = vand.u32 4294901760, %v179_v6 }
  0x4e   :  { %5794 = vst [vmem:[#allocation21_spill] sm:$0xff] %v4872_v28  ;;  %5795 = vst [vmem:[#allocation22_spill] sm:$0xff] %v4874_v29  ;;  %v218_v40 = vsub.f32 %v4813_v48, %v217_v58  ;;  %v4890_v41 = vpack.c.bf16 %v198_v11, %v191_v10  ;;  %v205_v46 = vand.u32 4294901760, %v204_v7  ;;  %v212_v47 = vand.u32 4294901760, %v211_v14 }
  0x4f   :  { %3974 = vmatpush3.bf16.msra.mxu0 %v4809_v45  ;;  %5796 = vst [vmem:[#allocation23_spill] sm:$0xff] %v4877_v30  ;;  %5797 = vst [vmem:[#allocation24_spill] sm:$0xff] %v4879_v33  ;;  %v225_v53 = vsub.f32 %v4825_v55, %v224_v8  ;;  %v232_v54 = vsub.f32 %v4831_v59, %v231_v15  ;;  %v239_v58 = vsub.f32 %v4834_v60, %v238_v16 }
  0x50   :  { %3975 = vmatprep.subr.bf16.mxu0 %v5749_v0  ;;  %5798 = vst [vmem:[#allocation25_spill] sm:$0xff] %v4881_v36  ;;  %5799 = vst [vmem:[#allocation26_spill] sm:$0xff] %v4883_v37  ;;  %v4896_v56 = vpack.c.bf16 %v212_v47, %v205_v46  ;;  %v219_v57 = vand.u32 4294901760, %v218_v40  ;;  %v246_v11 = vsub.f32 %v4836_v61, %v245_v17 }
  0x51   :  { %5800 = vst [vmem:[#allocation27_spill] sm:$0xff] %v4886_v38  ;;  %v226_v6 = vand.u32 4294901760, %v225_v53  ;;  %v233_v7 = vand.u32 4294901760, %v232_v54  ;;  %v240_v10 = vand.u32 4294901760, %v239_v58  ;;  %v253_v14 = vsub.f32 %v4838_v62, %v252_v19 }
  0x52   :  { %v260_v15 = vsub.f32 %v4840_v63, %v259_v20  ;;  %v267_v46 = vsub.f32 %v4842_v2, %v266_v21  ;;  %v274_v47 = vsub.f32 %v4844_v3, %v273_v23  ;;  %v281_v20 = vsub.f32 %v4846_v4, %v280_v24 }
  0x53   :  { %3977 = vmatpush3.bf16.msra.mxu0 %v4816_v49  ;;  %v4903_v8 = vpack.c.bf16 %v226_v6, %v219_v57  ;;  %v4910_v16 = vpack.c.bf16 %v240_v10, %v233_v7  ;;  %v254_v40 = vand.u32 4294901760, %v253_v14  ;;  %v288_v54 = vsub.f32 %v4848_v5, %v287_v25  ;;  %v4941_v10 = vld [vmem:[#allocation7] sm:$0xff]  ;;  %v4945_v14 = vld [vmem:[#allocation7 + $0x10] sm:$0xff] }
  0x54   :  { %3978 = vmatprep.subr.bf16.mxu0 %v5749_v0  ;;  %v261_v19 = vand.u32 4294901760, %v260_v15  ;;  %v268_v53 = vand.u32 4294901760, %v267_v46  ;;  %v275_v21 = vand.u32 4294901760, %v274_v47  ;;  %v282_v6 = vand.u32 4294901760, %v281_v20  ;;  %v4961_v47 = vld [vmem:[#allocation7 + $0x20] sm:$0xff] }
  0x55   :  { %v295_v23 = vsub.f32 %v4855_v9, %v294_v26  ;;  %v289_v7 = vand.u32 4294901760, %v288_v54  ;;  %v4937_v26 = vpack.c.bf16 %v4797_v35, %v4795_v34  ;;  %v4950_v15 = vpack.c.bf16 %v4806_v44, %v4804_v43 }
  0x56   :  { %v4922_v57 = vpack.c.bf16 %v268_v53, %v261_v19  ;;  %v4927_v58 = vpack.c.bf16 %v282_v6, %v275_v21  ;;  %v5743_v34 = vand.u32 4294901760, %v4941_v10  ;;  %v4963_v19 = vld [vmem:[#allocation7 + $0x28] sm:$0xff]  ;;  %v4974_v44 = vpack.c.bf16 %v4825_v55, %v4813_v48  ;;  %v4987_v21 = vld [vmem:[#allocation7 + $0x30] sm:$0xff]  ;;  %v4989_v48 = vld [vmem:[#allocation7 + $0x38] sm:$0xff] }
  0x57   :  { %3980 = vmatpush3.bf16.msra.mxu0 %v4818_v50  ;;  %v296_v24 = vand.u32 4294901760, %v295_v23  ;;  %v5731_v20 = vand.u32 4294901760, %v4961_v47  ;;  %v5730_v54 = vand.u32 4294901760, %v4963_v19  ;;  %v4994_v55 = vpack.c.bf16 %v4834_v60, %v4831_v59  ;;  %v5009_v59 = vld [vmem:[#allocation7 + $0x48] sm:$0xff] }
  0x58   :  { %3981 = vmatprep.subr.bf16.mxu0 %v5749_v0  ;;  %v5735_v23 = vand.u32 4294901760, %v4987_v21  ;;  %v5014_v60 = vpack.c.bf16 %v4838_v62, %v4836_v61  ;;  %v5029_v61 = vld [vmem:[#allocation7 + $0x58] sm:$0xff]  ;;  %v5034_v62 = vpack.c.bf16 %v4842_v2, %v4840_v63  ;;  %v5050_v63 = vpack.c.bf16 %v4846_v4, %v4844_v3 }
  0x59   :  { %v4931_v25 = vpack.c.bf16 %v296_v24, %v289_v7  ;;  %v5001_v6 = vpack.c.bf16 %v5730_v54, %v5731_v20  ;;  %v5734_v7 = vand.u32 4294901760, %v4989_v48  ;;  %v5007_v24 = vld [vmem:[#allocation7 + $0x40] sm:$0xff] }
  0x5a   :  { %v5742_v20 = vand.u32 4294901760, %v5007_v24 }
  0x5b   :  { %3983 = vmatpush3.bf16.msra.mxu0 %v4820_v51  ;;  %v5021_v54 = vpack.c.bf16 %v5734_v7, %v5735_v23 }
  0x5c   :  { %3984 = vmatprep.subr.bf16.mxu0 %v5749_v0 }
  0x5e   :  { %3153 = vmatmul.mubr.f32.vlgmr.msra.gmra.mrb[0].mxu0 %v180_v39  ;;  %v247_v39 = vand.u32 4294901760, %v246_v11  ;;  %v4943_v11 = vld [vmem:[#allocation7 + $0x8] sm:$0xff] }
  0x5f   :  { %3986 = vmatpush3.bf16.msra.mxu0 %v4890_v41  ;;  %3187 = vmatprep.mubr.msk.f32.mxu0 %vm4693_vm0, %v5738_v1  ;;  %v5736_v35 = vand.u32 4294901760, %v4943_v11 }
  0x60   :  { %3987 = vmatprep.subr.bf16.mxu0 %v5749_v0  ;;  %v4916_v17 = vpack.c.bf16 %v254_v40, %v247_v39  ;;  %v4956_v39 = vld [vmem:[#allocation7 + $0x18] sm:$0xff]  ;;  %v5733_v40 = vand.u32 4294901760, %v4945_v14 }
  0x61   :  { %v5732_v46 = vand.u32 4294901760, %v4956_v39  ;;  %v4969_v43 = vpack.c.bf16 %v5736_v35, %v5743_v34  ;;  %v5740_v35 = vand.u32 4294901760, %v5029_v61 }
  0x63   :  { %3989 = vmatpush3.bf16.msra.mxu0 %v4896_v56  ;;  %4106 = vmatpush3.bf16.msra.mxu1 %v4969_v43  ;;  %v4981_v53 = vpack.c.bf16 %v5732_v46, %v5733_v40  ;;  %v5737_v46 = vand.u32 4294901760, %v5009_v59  ;;  %v5027_v40 = vld [vmem:[#allocation7 + $0x50] sm:$0xff] }
  0x64   :  { %3990 = vmatprep.subr.bf16.mxu0 %v5749_v0  ;;  %4107 = vmatprep.subr.bf16.mxu1 %v5749_v0  ;;  %v5741_v23 = vand.u32 4294901760, %v5027_v40 }
  0x65   :  { %v5041_v7 = vpack.c.bf16 %v5737_v46, %v5742_v20  ;;  %v5064_v46 = vpack.c.bf16 %v4855_v9, %v4848_v5  ;;  %v93_v5 = vld [vmem:[#allocation7 + $0x70] sm:$0xff]  ;;  %v94_v9 = vld [vmem:[#allocation7 + $0x78] sm:$0xff] }
  0x66   :  { %v5057_v2 = vpack.c.bf16 %v5740_v35, %v5741_v23  ;;  %v782_v35 = vand.u32 4294901760, %v94_v9 }
  0x67   :  { %3992 = vmatpush3.bf16.msra.mxu0 %v4903_v8  ;;  %4109 = vmatpush3.bf16.msra.mxu1 %v4981_v53 }
  0x68   :  { %3993 = vmatprep.subr.bf16.mxu0 %v5749_v0  ;;  %4110 = vmatprep.subr.bf16.mxu1 %v5749_v0 }
  0x6b   :  { %3995 = vmatpush3.bf16.msra.mxu0 %v4910_v16  ;;  %4112 = vmatpush3.bf16.msra.mxu1 %v5001_v6 }
  0x6c   :  { %3996 = vmatprep.subr.bf16.mxu0 %v5749_v0  ;;  %4113 = vmatprep.subr.bf16.mxu1 %v5749_v0 }
  0x6f   :  { %3998 = vmatpush3.bf16.msra.mxu0 %v4916_v17  ;;  %4115 = vmatpush3.bf16.msra.mxu1 %v5021_v54 }
  0x70   :  { %3999 = vmatprep.subr.bf16.mxu0 %v5749_v0  ;;  %4116 = vmatprep.subr.bf16.mxu1 %v5749_v0 }
  0x73   :  { %4001 = vmatpush3.bf16.msra.mxu0 %v4922_v57  ;;  %4118 = vmatpush3.bf16.msra.mxu1 %v5041_v7 }
  0x74   :  { %4002 = vmatprep.subr.bf16.mxu0 %v5749_v0  ;;  %4119 = vmatprep.subr.bf16.mxu1 %v5749_v0 }
  0x77   :  { %4004 = vmatpush3.bf16.msra.mxu0 %v4927_v58  ;;  %4121 = vmatpush3.bf16.msra.mxu1 %v5057_v2 }
  0x78   :  { %4005 = vmatprep.subr.bf16.mxu0 %v5749_v0  ;;  %4122 = vmatprep.subr.bf16.mxu1 %v5749_v0 }
  0x7b   :  { %4007 = vmatpush3.bf16.msra.mxu0 %v4931_v25 }
  0x7c   :  { %4008 = vmatprep.subr.bf16.mxu0 %v5749_v0 }
  0x7e   :  { %3188 = vmatmul.mubr.f32.vlgmr.msra.gmra.mrb[0].mxu0 %v4790_v31 }
  0x7f   :  { %4010 = vmatpush3.bf16.msra.mxu0 %v4937_v26  ;;  %3222 = vmatprep.mubr.msk.f32.mxu0 %vm4693_vm0, %v5738_v1 }
  0x80   :  { %4011 = vmatprep.subr.bf16.mxu0 %v5749_v0 }
  0x83   :  { %4013 = vmatpush3.bf16.msra.mxu0 %v4950_v15 }
  0x84   :  { %4014 = vmatprep.subr.bf16.mxu0 %v5749_v0 }
  0x87   :  { %4016 = vmatpush3.bf16.msra.mxu0 %v4974_v44 }
  0x88   :  { %4017 = vmatprep.subr.bf16.mxu0 %v5749_v0 }
  0x8b   :  { %4019 = vmatpush3.bf16.msra.mxu0 %v4994_v55 }
  0x8c   :  { %4020 = vmatprep.subr.bf16.mxu0 %v5749_v0 }
  0x8f   :  { %4022 = vmatpush3.bf16.msra.mxu0 %v5014_v60 }
  0x90   :  { %4023 = vmatprep.subr.bf16.mxu0 %v5749_v0 }
  0x93   :  { %4025 = vmatpush3.bf16.msra.mxu0 %v5034_v62 }
  0x94   :  { %4026 = vmatprep.subr.bf16.mxu0 %v5749_v0 }
  0x97   :  { %4028 = vmatpush3.bf16.msra.mxu0 %v5050_v63 }
  0x98   :  { %4029 = vmatprep.subr.bf16.mxu0 %v5749_v0 }
  0x9b   :  { %4031 = vmatpush3.bf16.msra.mxu0 %v5064_v46 }
  0x9c   :  { %4032 = vmatprep.subr.bf16.mxu0 %v5749_v0 }
  0x9e   :  { %3223 = vmatmul.mubr.f32.vlgmr.msra.gmra.mrb[0].mxu0 %v4802_v42  ;;  %v92_v42 = vld [vmem:[#allocation7 + $0x68] sm:$0xff] }
  0x9f   :  { %4034 = vmatpush3.bf16.msra.mxu0 %v4777_v12  ;;  %3257 = vmatprep.mubr.msk.f32.mxu0 %vm4693_vm0, %v5738_v1  ;;  %v776_v3 = vand.u32 4294901760, %v92_v42 }
  0xa0   :  { %4035 = vmatprep.subr.bf16.mxu0 %v5749_v0 }
  0xa1   :  { %v5158_v34 = vsub.f32 %v92_v42, %v776_v3 }
  0xa3   :  { %4037 = vmatpush3.bf16.msra.mxu0 %v4780_v13 }
  0xa4   :  { %4038 = vmatprep.subr.bf16.mxu0 %v5749_v0 }
  0xa7   :  { %4040 = vmatpush3.bf16.msra.mxu0 %v4784_v18 }
  0xa8   :  { %4041 = vmatprep.subr.bf16.mxu0 %v5749_v0 }
  0xab   :  { %4043 = vmatpush3.bf16.msra.mxu0 %v4793_v32 }
  0xac   :  { %4044 = vmatprep.subr.bf16.mxu0 %v5749_v0 }
  0xaf   :  { %4046 = vmatpush3.bf16.msra.mxu0 %v4809_v45 }
  0xb0   :  { %4047 = vmatprep.subr.bf16.mxu0 %v5749_v0 }
  0xb3   :  { %4049 = vmatpush3.bf16.msra.mxu0 %v4816_v49 }
  0xb4   :  { %4050 = vmatprep.subr.bf16.mxu0 %v5749_v0 }
  0xb7   :  { %4052 = vmatpush3.bf16.msra.mxu0 %v4818_v50 }
  0xb8   :  { %4053 = vmatprep.subr.bf16.mxu0 %v5749_v0 }
  0xbb   :  { %4055 = vmatpush3.bf16.msra.mxu0 %v4820_v51 }
  0xbc   :  { %4056 = vmatprep.subr.bf16.mxu0 %v5749_v0 }
  0xbe   :  { %3258 = vmatmul.mubr.f32.vlgmr.msra.gmra.mrb[0].mxu0 %v178_v52 }
  0xbf   :  { %4058 = vmatpush3.bf16.msra.mxu0 %v4870_v27  ;;  %3292 = vmatprep.mubr.msk.f32.mxu0 %vm4693_vm0, %v5738_v1 }
  0xc0   :  { %4059 = vmatprep.subr.bf16.mxu0 %v5749_v0 }
  0xc3   :  { %4061 = vmatpush3.bf16.msra.mxu0 %v4872_v28 }
  0xc4   :  { %4062 = vmatprep.subr.bf16.mxu0 %v5749_v0 }
  0xc7   :  { %4064 = vmatpush3.bf16.msra.mxu0 %v4874_v29 }
  0xc8   :  { %4065 = vmatprep.subr.bf16.mxu0 %v5749_v0 }
  0xcb   :  { %4067 = vmatpush3.bf16.msra.mxu0 %v4877_v30  ;;  %v5167_v30 = vsub.f32 %v94_v9, %v782_v35 }
  0xcc   :  { %4068 = vmatprep.subr.bf16.mxu0 %v5749_v0 }
  0xcf   :  { %4070 = vmatpush3.bf16.msra.mxu0 %v4879_v33 }
  0xd0   :  { %4071 = vmatprep.subr.bf16.mxu0 %v5749_v0 }
  0xd3   :  { %4073 = vmatpush3.bf16.msra.mxu0 %v4881_v36 }
  0xd4   :  { %4074 = vmatprep.subr.bf16.mxu0 %v5749_v0 }
  0xd7   :  { %4076 = vmatpush3.bf16.msra.mxu0 %v4883_v37  ;;  %v5754_v37 = vand.u32 4294901760, %v5158_v34 }
  0xd8   :  { %4077 = vmatprep.subr.bf16.mxu0 %v5749_v0 }
  0xdb   :  { %4079 = vmatpush3.bf16.msra.mxu0 %v4886_v38 }
  0xdc   :  { %4080 = vmatprep.subr.bf16.mxu0 %v5749_v0 }
  0xde   :  { %3293 = vmatmul.mubr.f32.vlgmr.msra.gmra.mrb[0].mxu0 %v4790_v31 }
  0xdf   :  { %4082 = vmatpush3.bf16.msra.mxu0 %v4777_v12  ;;  %3327 = vmatprep.mubr.msk.f32.mxu0 %vm4693_vm0, %v5738_v1 }
  0xe0   :  { %4083 = vmatprep.subr.bf16.mxu0 %v5749_v0 }
  0xe3   :  { %4085 = vmatpush3.bf16.msra.mxu0 %v4780_v13 }
  0xe4   :  { %4086 = vmatprep.subr.bf16.mxu0 %v5749_v0 }
  0xe7   :  { %4088 = vmatpush3.bf16.msra.mxu0 %v4784_v18 }
  0xe8   :  { %4089 = vmatprep.subr.bf16.mxu0 %v5749_v0 }
  0xeb   :  { %4091 = vmatpush3.bf16.msra.mxu0 %v4793_v32 }
  0xec   :  { %4092 = vmatprep.subr.bf16.mxu0 %v5749_v0 }
  0xef   :  { %4094 = vmatpush3.bf16.msra.mxu0 %v4809_v45 }
  0xf0   :  { %4095 = vmatprep.subr.bf16.mxu0 %v5749_v0 }
  0xf3   :  { %4097 = vmatpush3.bf16.msra.mxu0 %v4816_v49 }
  0xf4   :  { %4098 = vmatprep.subr.bf16.mxu0 %v5749_v0 }
  0xf7   :  { %4100 = vmatpush3.bf16.msra.mxu0 %v4818_v50 }
  0xf8   :  { %4101 = vmatprep.subr.bf16.mxu0 %v5749_v0 }
  0xfb   :  { %4103 = vmatpush3.bf16.msra.mxu0 %v4820_v51 }
  0xfc   :  { %4248 = vmatprep.subr.bf16.mxu0 %v5749_v0 }
  0xfe   :  { %3328 = vmatmul.mubr.f32.vlgmr.msra.gmra.mrb[0].mxu0 %v4790_v31  ;;  %v91_v31 = vld [vmem:[#allocation7 + $0x60] sm:$0xff] }
  0xff   :  { %4250 = vmatpush3.bf16.msra.mxu0 %v4777_v12  ;;  %3572 = vmatprep.mubr.msk.f32.mxu0 %vm4693_vm0, %v5738_v1  ;;  %v773_v52 = vand.u32 4294901760, %v91_v31  ;;  %v779_v1 = vand.u32 4294901760, %v93_v5 }
 0x100   :  { %4251 = vmatprep.subr.bf16.mxu0 %v5749_v0 }
 0x101   :  { %v5148_v4 = vpack.c.bf16 %v776_v3, %v773_v52  ;;  %v5152_v23 = vpack.c.bf16 %v782_v35, %v779_v1  ;;  %v5156_v20 = vsub.f32 %v91_v31, %v773_v52  ;;  %v5165_v33 = vsub.f32 %v93_v5, %v779_v1 }
 0x102   :  { %v5755_v52 = vand.u32 4294901760, %v5167_v30 }
 0x103   :  { %4253 = vmatpush3.bf16.msra.mxu0 %v4780_v13  ;;  %4124 = vmatpush3.bf16.msra.mxu1 %v5148_v4  ;;  %v5752_v38 = vand.u32 4294901760, %v5156_v20  ;;  %v5753_v42 = vand.u32 4294901760, %v5165_v33 }
 0x104   :  { %4254 = vmatprep.subr.bf16.mxu0 %v5749_v0  ;;  %4125 = vmatprep.subr.bf16.mxu1 %v5749_v0  ;;  %v936_v1 = vsub.f32 %v5167_v30, %v5755_v52 }
 0x105   :  { %v915_v36 = vsub.f32 %v5156_v20, %v5752_v38  ;;  %v929_v29 = vsub.f32 %v5165_v33, %v5753_v42  ;;  %v5803_v42 = vand.u32 4294901760, %v4941_v10 }
 0x106   :  { %v937_v9 = vand.u32 4294901760, %v936_v1 }
 0x107   :  { %4256 = vmatpush3.bf16.msra.mxu0 %v4784_v18  ;;  %4127 = vmatpush3.bf16.msra.mxu1 %v5152_v23  ;;  %v916_v31 = vand.u32 4294901760, %v915_v36  ;;  %v930_v5 = vand.u32 4294901760, %v929_v29  ;;  %v5186_v36 = vpack.c.bf16 %v5158_v34, %v5156_v20 }
 0x108   :  { %4257 = vmatprep.subr.bf16.mxu0 %v5749_v0  ;;  %4128 = vmatprep.subr.bf16.mxu1 %v5749_v0 }
 0x109   :  { %v5182_v38 = vpack.c.bf16 %v937_v9, %v930_v5  ;;  %5801 = vst [vmem:[#allocation28_spill] sm:$0xff] %v5186_v36  ;;  %v5806_v5 = vand.u32 4294901760, %v4956_v39 }
 0x10b   :  { %4259 = vmatpush3.bf16.msra.mxu0 %v4793_v32  ;;  %v5210_v9 = vsub.f32 %v4956_v39, %v5806_v5 }
 0x10c   :  { %4260 = vmatprep.subr.bf16.mxu0 %v5749_v0 }
 0x10f   :  { %4262 = vmatpush3.bf16.msra.mxu0 %v4809_v45 }
 0x110   :  { %4263 = vmatprep.subr.bf16.mxu0 %v5749_v0 }
 0x113   :  { %4265 = vmatpush3.bf16.msra.mxu0 %v4816_v49 }
 0x114   :  { %4266 = vmatprep.subr.bf16.mxu0 %v5749_v0 }
 0x117   :  { %4268 = vmatpush3.bf16.msra.mxu0 %v4818_v50 }
 0x118   :  { %4269 = vmatprep.subr.bf16.mxu0 %v5749_v0 }
 0x11b   :  { %4271 = vmatpush3.bf16.msra.mxu0 %v4820_v51  ;;  %v5810_v51 = vand.u32 4294901760, %v5210_v9 }
 0x11c   :  { %4272 = vmatprep.subr.bf16.mxu0 %v5749_v0  ;;  %v922_v0 = vsub.f32 %v5158_v34, %v5754_v37  ;;  %v5195_v37 = vsub.f32 %v4941_v10, %v5803_v42 }
 0x11e   :  { %v923_v3 = vand.u32 4294901760, %v922_v0  ;;  %v5190_v0 = vpack.c.bf16 %v5167_v30, %v5165_v33  ;;  %v5762_v52 = vand.u32 4294901760, %v5195_v37 }
 0x120   :  { %v5180_v35 = vpack.c.bf16 %v923_v3, %v916_v31  ;;  %5802 = vst [vmem:[#allocation29_spill] sm:$0xff] %v5190_v0  ;;  %v5804_v31 = vand.u32 4294901760, %v4943_v11  ;;  %v5805_v3 = vand.u32 4294901760, %v4945_v14  ;;  %v831_v5 = vsub.f32 %v5195_v37, %v5762_v52 }
 0x122   :  { %v5200_v29 = vsub.f32 %v4943_v11, %v5804_v31  ;;  %v5205_v1 = vsub.f32 %v4945_v14, %v5805_v3  ;;  %v5807_v11 = vand.u32 4294901760, %v4961_v47  ;;  %v5808_v14 = vand.u32 4294901760, %v4963_v19 }
 0x123   :  { %v832_v45 = vand.u32 4294901760, %v831_v5 }
 0x124   :  { %v5763_v10 = vand.u32 4294901760, %v5200_v29  ;;  %v5219_v31 = vsub.f32 %v4961_v47, %v5807_v11  ;;  %v5224_v3 = vsub.f32 %v4963_v19, %v5808_v14  ;;  %v5809_v47 = vand.u32 4294901760, %v5205_v1 }
 0x125   :  { %v852_v19 = vsub.f32 %v5210_v9, %v5810_v51 }
 0x126   :  { %v838_v42 = vsub.f32 %v5200_v29, %v5763_v10  ;;  %v845_v11 = vsub.f32 %v5205_v1, %v5809_v47  ;;  %v5811_v10 = vand.u32 4294901760, %v4987_v21 }
 0x127   :  { %v853_v18 = vand.u32 4294901760, %v852_v19 }
 0x128   :  { %v5248_v49 = vsub.f32 %v4987_v21, %v5811_v10  ;;  %v839_v32 = vand.u32 4294901760, %v838_v42  ;;  %v846_v14 = vand.u32 4294901760, %v845_v11  ;;  %v5814_v10 = vand.u32 4294901760, %v5224_v3 }
 0x129   :  { %v5815_v11 = vand.u32 4294901760, %v5007_v24 }
 0x12a   :  { %v866_v13 = vsub.f32 %v5224_v3, %v5814_v10  ;;  %v5267_v5 = vpack.c.bf16 %v839_v32, %v832_v45  ;;  %v5279_v12 = vpack.c.bf16 %v853_v18, %v846_v14  ;;  %v5817_v42 = vand.u32 4294901760, %v5248_v49 }
 0x12b   :  { %v5272_v19 = vsub.f32 %v5007_v24, %v5815_v11  ;;  %v5819_v18 = vand.u32 4294901760, %v5027_v40 }
 0x12c   :  { %v873_v32 = vsub.f32 %v5248_v49, %v5817_v42 }
 0x12d   :  { %v5778_v11 = vand.u32 4294901760, %v5272_v19  ;;  %v5293_v14 = vsub.f32 %v5027_v40, %v5819_v18 }
 0x12f   :  { %v887_v40 = vsub.f32 %v5272_v19, %v5778_v11  ;;  %v5780_v18 = vand.u32 4294901760, %v5293_v14 }
 0x1d1   :  { %v732_v39 = vpop.f32.mrb[0].mxu0 }
 0x1d2   :  { %v5232_v28 = vand.u32 4294901760, %v732_v39  ;;  %v3329_v27 = vpop.f32.mrb[1].mxu0 }
 0x1d3   :  { %v5812_v27 = vand.u32 4294901760, %v4989_v48 }
 0x1d4   :  { %v5242_v50 = vsub.f32 %v732_v39, %v5232_v28  ;;  %v5813_v39 = vand.u32 4294901760, %v5219_v31 }
 0x1d5   :  { %v5253_v47 = vsub.f32 %v4989_v48, %v5812_v27  ;;  %v5816_v27 = vand.u32 4294901760, %v5009_v59  ;;  %v867_v48 = vand.u32 4294901760, %v866_v13  ;;  %v5820_v13 = vand.u32 4294901760, %v5029_v61 }
 0x1d6   :  { %v5774_v51 = vand.u32 4294901760, %v5242_v50  ;;  %v859_v52 = vsub.f32 %v5219_v31, %v5813_v39 }
 0x1d7   :  { %v5277_v39 = vsub.f32 %v5009_v59, %v5816_v27  ;;  %v5818_v45 = vand.u32 4294901760, %v5253_v47  ;;  %v874_v27 = vand.u32 4294901760, %v873_v32 }
 0x1d8   :  { %v820_v21 = vsub.f32 %v5242_v50, %v5774_v51  ;;  %v860_v10 = vand.u32 4294901760, %v859_v52  ;;  %v5298_v52 = vsub.f32 %v5029_v61, %v5820_v13 }
 0x1d9   :  { %v880_v24 = vsub.f32 %v5253_v47, %v5818_v45  ;;  %v5777_v59 = vand.u32 4294901760, %v5277_v39 }
 0x1da   :  { %v821_v51 = vand.u32 4294901760, %v820_v21  ;;  %v5822_v21 = vmov 0.0|0.0   ;;  %v5303_v42 = vpack.c.bf16 %v867_v48, %v860_v10  ;;  %v5779_v13 = vand.u32 4294901760, %v5298_v52 }
 0x1db   :  { %v881_v45 = vand.u32 4294901760, %v880_v24  ;;  %v894_v61 = vsub.f32 %v5277_v39, %v5777_v59  ;;  %v888_v10 = vand.u32 4294901760, %v887_v40  ;;  %v901_v24 = vsub.f32 %v5293_v14, %v5780_v18 }
 0x1dc   :  { %3363 = vmatmul.mubr.f32.vlgmr.msra.gmra.mrb[0].mxu1 %v821_v51  ;;  %v5821_v51 = vmov 0.0   ;;  %v908_v59 = vsub.f32 %v5298_v52, %v5779_v13  ;;  %v5826_v13 = vand.u32 4294901760, %v5200_v29 }
 0x1dd   :  { %4130 = vmatpush3.bf16.msra.mxu1 %v5267_v5  ;;  %3397 = vmatprep.mubr.msk.f32.mxu1 %vm4693_vm0, %v5821_v51  ;;  %v5315_v48 = vpack.c.bf16 %v881_v45, %v874_v27  ;;  %v895_v32 = vand.u32 4294901760, %v894_v61  ;;  %v902_v27 = vand.u32 4294901760, %v901_v24  ;;  %v5347_v61 = vpack.c.bf16 %v5210_v9, %v5205_v1 }
 0x1de   :  { %4131 = vmatprep.subr.bf16.mxu1 %v5822_v21  ;;  %v909_v45 = vand.u32 4294901760, %v908_v59  ;;  %v5340_v59 = vpack.c.bf16 %v5200_v29, %v5195_v37  ;;  %v5367_v24 = vpack.c.bf16 %v5277_v39, %v5272_v19  ;;  %v5833_v29 = vand.u32 4294901760, %v5253_v47 }
 0x1df   :  { %v5326_v11 = vpack.c.bf16 %v895_v32, %v888_v10  ;;  %v5355_v10 = vpack.c.bf16 %v5224_v3, %v5219_v31  ;;  %v5361_v32 = vpack.c.bf16 %v5253_v47, %v5248_v49  ;;  %v5837_v47 = vand.u32 4294901760, %v5298_v52 }
 0x1e0   :  { %v5330_v40 = vpack.c.bf16 %v909_v45, %v902_v27  ;;  %5823 = vst [vmem:[#allocation30_spill] sm:$0xff] %v5367_v24  ;;  %v5373_v27 = vpack.c.bf16 %v5298_v52, %v5293_v14  ;;  %v5825_v45 = vand.u32 4294901760, %v5195_v37  ;;  %v5830_v37 = vand.u32 4294901760, %v5219_v31 }
 0x1e1   :  { %4133 = vmatpush3.bf16.msra.mxu1 %v5279_v12  ;;  %v5835_v31 = vand.u32 4294901760, %v5277_v39  ;;  %v5839_v39 = vand.u32 4294901760, %v5158_v34  ;;  %v5841_v52 = vand.u32 4294901760, %v5167_v30 }
 0x1e2   :  { %4134 = vmatprep.subr.bf16.mxu1 %v5822_v21  ;;  %5824 = vst [vmem:[#allocation31_spill] sm:$0xff] %v5373_v27  ;;  %v5404_v18 = vpack.c.bf16 %v5826_v13, %v5825_v45 }
 0x1e5   :  { %4136 = vmatpush3.bf16.msra.mxu1 %v5303_v42 }
 0x1e6   :  { %4137 = vmatprep.subr.bf16.mxu1 %v5822_v21 }
 0x1e9   :  { %4139 = vmatpush3.bf16.msra.mxu1 %v5315_v48 }
 0x1ea   :  { %4140 = vmatprep.subr.bf16.mxu1 %v5822_v21 }
 0x1ed   :  { %4142 = vmatpush3.bf16.msra.mxu1 %v5326_v11 }
 0x1ee   :  { %4143 = vmatprep.subr.bf16.mxu1 %v5822_v21 }
 0x1f1   :  { %4145 = vmatpush3.bf16.msra.mxu1 %v5330_v40 }
 0x1f2   :  { %4146 = vmatprep.subr.bf16.mxu1 %v5822_v21 }
 0x1f5   :  { %4148 = vmatpush3.bf16.msra.mxu1 %v5180_v35 }
 0x1f6   :  { %4149 = vmatprep.subr.bf16.mxu1 %v5822_v21 }
 0x1f9   :  { %4151 = vmatpush3.bf16.msra.mxu1 %v5182_v38 }
 0x1fa   :  { %4152 = vmatprep.subr.bf16.mxu1 %v5822_v21 }
 0x1fc   :  { %3398 = vmatmul.mubr.f32.vlgmr.msra.gmra.mrb[0].mxu1 %v5232_v28 }
 0x1fd   :  { %4154 = vmatpush3.bf16.msra.mxu1 %v5340_v59  ;;  %3432 = vmatprep.mubr.msk.f32.mxu1 %vm4693_vm0, %v5821_v51 }
 0x1fe   :  { %4155 = vmatprep.subr.bf16.mxu1 %v5822_v21 }
 0x201   :  { %4157 = vmatpush3.bf16.msra.mxu1 %v5347_v61 }
 0x202   :  { %4158 = vmatprep.subr.bf16.mxu1 %v5822_v21 }
 0x205   :  { %4160 = vmatpush3.bf16.msra.mxu1 %v5355_v10 }
 0x206   :  { %4161 = vmatprep.subr.bf16.mxu1 %v5822_v21 }
 0x209   :  { %4163 = vmatpush3.bf16.msra.mxu1 %v5361_v32 }
 0x20a   :  { %4164 = vmatprep.subr.bf16.mxu1 %v5822_v21 }
 0x20d   :  { %4166 = vmatpush3.bf16.msra.mxu1 %v5367_v24 }
 0x20e   :  { %4167 = vmatprep.subr.bf16.mxu1 %v5822_v21 }
 0x211   :  { %4169 = vmatpush3.bf16.msra.mxu1 %v5373_v27  ;;  %v5829_v27 = vand.u32 4294901760, %v5210_v9  ;;  %v5834_v9 = vand.u32 4294901760, %v5272_v19  ;;  %v5838_v19 = vand.u32 4294901760, %v5156_v20 }
 0x212   :  { %4170 = vmatprep.subr.bf16.mxu1 %v5822_v21 }
 0x215   :  { %4172 = vmatpush3.bf16.msra.mxu1 %v5186_v36  ;;  %v5828_v36 = vand.u32 4294901760, %v5205_v1 }
 0x216   :  { %4173 = vmatprep.subr.bf16.mxu1 %v5822_v21 }
 0x217   :  { %v5414_v24 = vpack.c.bf16 %v5829_v27, %v5828_v36  ;;  %v5832_v36 = vand.u32 4294901760, %v5248_v49  ;;  %v5836_v49 = vand.u32 4294901760, %v5293_v14  ;;  %v5456_v27 = vpack.c.bf16 %v5839_v39, %v5838_v19 }
 0x218   :  { %v5840_v14 = vand.u32 4294901760, %v5165_v33 }
 0x219   :  { %4175 = vmatpush3.bf16.msra.mxu1 %v5190_v0  ;;  %v5827_v0 = vand.u32 4294901760, %v5242_v50  ;;  %v5432_v1 = vpack.c.bf16 %v5833_v29, %v5832_v36  ;;  %v5448_v13 = vpack.c.bf16 %v5837_v47, %v5836_v49 }
 0x21a   :  { %4176 = vmatprep.subr.bf16.mxu1 %v5822_v21  ;;  %v5464_v45 = vpack.c.bf16 %v5841_v52, %v5840_v14 }
 0x21c   :  { %3433 = vmatmul.mubr.f32.vlgmr.msra.gmra.mrb[0].mxu1 %v5242_v50  ;;  %v5831_v50 = vand.u32 4294901760, %v5224_v3  ;;  %v5440_v3 = vpack.c.bf16 %v5835_v31, %v5834_v9 }
 0x21d   :  { %4178 = vmatpush3.bf16.msra.mxu1 %v4969_v43  ;;  %3467 = vmatprep.mubr.msk.f32.mxu1 %vm4693_vm0, %v5821_v51 }
 0x21e   :  { %4179 = vmatprep.subr.bf16.mxu1 %v5822_v21 }
 0x221   :  { %4181 = vmatpush3.bf16.msra.mxu1 %v4981_v53 }
 0x222   :  { %4182 = vmatprep.subr.bf16.mxu1 %v5822_v21 }
 0x225   :  { %4184 = vmatpush3.bf16.msra.mxu1 %v5001_v6 }
 0x226   :  { %4185 = vmatprep.subr.bf16.mxu1 %v5822_v21 }
 0x229   :  { %4187 = vmatpush3.bf16.msra.mxu1 %v5021_v54 }
 0x22a   :  { %4188 = vmatprep.subr.bf16.mxu1 %v5822_v21 }
 0x22d   :  { %4190 = vmatpush3.bf16.msra.mxu1 %v5041_v7 }
 0x22e   :  { %4191 = vmatprep.subr.bf16.mxu1 %v5822_v21 }
 0x231   :  { %4193 = vmatpush3.bf16.msra.mxu1 %v5057_v2 }
 0x232   :  { %4194 = vmatprep.subr.bf16.mxu1 %v5822_v21 }
 0x235   :  { %4196 = vmatpush3.bf16.msra.mxu1 %v5148_v4 }
 0x236   :  { %4197 = vmatprep.subr.bf16.mxu1 %v5822_v21 }
 0x239   :  { %4199 = vmatpush3.bf16.msra.mxu1 %v5152_v23 }
 0x23a   :  { %4200 = vmatprep.subr.bf16.mxu1 %v5822_v21 }
 0x23c   :  { %3468 = vmatmul.mubr.f32.vlgmr.msra.gmra.mrb[0].mxu1 %v5827_v0  ;;  %v5424_v0 = vpack.c.bf16 %v5831_v50, %v5830_v37 }
 0x23d   :  { %4202 = vmatpush3.bf16.msra.mxu1 %v5404_v18  ;;  %3502 = vmatprep.mubr.msk.f32.mxu1 %vm4693_vm0, %v5821_v51 }
 0x23e   :  { %4203 = vmatprep.subr.bf16.mxu1 %v5822_v21 }
 0x241   :  { %4205 = vmatpush3.bf16.msra.mxu1 %v5414_v24 }
 0x242   :  { %4206 = vmatprep.subr.bf16.mxu1 %v5822_v21 }
 0x245   :  { %4208 = vmatpush3.bf16.msra.mxu1 %v5424_v0 }
 0x246   :  { %4209 = vmatprep.subr.bf16.mxu1 %v5822_v21 }
 0x249   :  { %4211 = vmatpush3.bf16.msra.mxu1 %v5432_v1 }
 0x24a   :  { %4212 = vmatprep.subr.bf16.mxu1 %v5822_v21 }
 0x24d   :  { %4214 = vmatpush3.bf16.msra.mxu1 %v5440_v3 }
 0x24e   :  { %4215 = vmatprep.subr.bf16.mxu1 %v5822_v21 }
 0x251   :  { %4217 = vmatpush3.bf16.msra.mxu1 %v5448_v13 }
 0x252   :  { %4218 = vmatprep.subr.bf16.mxu1 %v5822_v21 }
 0x255   :  { %4220 = vmatpush3.bf16.msra.mxu1 %v5456_v27 }
 0x256   :  { %4221 = vmatprep.subr.bf16.mxu1 %v5822_v21 }
 0x259   :  { %4223 = vmatpush3.bf16.msra.mxu1 %v5464_v45 }
 0x25a   :  { %4224 = vmatprep.subr.bf16.mxu1 %v5822_v21 }
 0x25c   :  { %3503 = vmatmul.mubr.f32.vlgmr.msra.gmra.mrb[0].mxu1 %v5232_v28 }
 0x25d   :  { %4226 = vmatpush3.bf16.msra.mxu1 %v4969_v43  ;;  %3537 = vmatprep.mubr.msk.f32.mxu1 %vm4693_vm0, %v5821_v51 }
 0x25e   :  { %4227 = vmatprep.subr.bf16.mxu1 %v5822_v21 }
 0x261   :  { %4229 = vmatpush3.bf16.msra.mxu1 %v4981_v53 }
 0x262   :  { %4230 = vmatprep.subr.bf16.mxu1 %v5822_v21 }
 0x265   :  { %4232 = vmatpush3.bf16.msra.mxu1 %v5001_v6 }
 0x266   :  { %4233 = vmatprep.subr.bf16.mxu1 %v5822_v21 }
 0x269   :  { %4235 = vmatpush3.bf16.msra.mxu1 %v5021_v54 }
 0x26a   :  { %4236 = vmatprep.subr.bf16.mxu1 %v5822_v21 }
 0x26d   :  { %4238 = vmatpush3.bf16.msra.mxu1 %v5041_v7 }
 0x26e   :  { %4239 = vmatprep.subr.bf16.mxu1 %v5822_v21 }
 0x271   :  { %4241 = vmatpush3.bf16.msra.mxu1 %v5057_v2 }
 0x272   :  { %4242 = vmatprep.subr.bf16.mxu1 %v5822_v21 }
 0x275   :  { %4244 = vmatpush3.bf16.msra.mxu1 %v5148_v4 }
 0x276   :  { %4245 = vmatprep.subr.bf16.mxu1 %v5822_v21 }
 0x279   :  { %4247 = vmatpush3.bf16.msra.mxu1 %v5152_v23 }
 0x27a   :  { %4392 = vmatprep.subr.bf16.mxu1 %v5822_v21 }
 0x27c   :  { %3538 = vmatmul.mubr.f32.vlgmr.msra.gmra.mrb[0].mxu1 %v5232_v28 }
 0x27d   :  { %4394 = vmatpush3.bf16.msra.mxu1 %v4969_v43  ;;  %3782 = vmatprep.mubr.msk.f32.mxu1 %vm4693_vm0, %v5821_v51 }
 0x27e   :  { %4395 = vmatprep.subr.bf16.mxu1 %v5822_v21 }
 0x281   :  { %4397 = vmatpush3.bf16.msra.mxu1 %v4981_v53 }
 0x282   :  { %4398 = vmatprep.subr.bf16.mxu1 %v5822_v21 }
 0x285   :  { %4400 = vmatpush3.bf16.msra.mxu1 %v5001_v6 }
 0x286   :  { %4401 = vmatprep.subr.bf16.mxu1 %v5822_v21 }
 0x289   :  { %4403 = vmatpush3.bf16.msra.mxu1 %v5021_v54 }
 0x28a   :  { %4404 = vmatprep.subr.bf16.mxu1 %v5822_v21 }
 0x28d   :  { %4406 = vmatpush3.bf16.msra.mxu1 %v5041_v7 }
 0x28e   :  { %4407 = vmatprep.subr.bf16.mxu1 %v5822_v21 }
 0x291   :  { %4409 = vmatpush3.bf16.msra.mxu1 %v5057_v2 }
 0x292   :  { %4410 = vmatprep.subr.bf16.mxu1 %v5822_v21 }
 0x295   :  { %4412 = vmatpush3.bf16.msra.mxu1 %v5148_v4 }
 0x296   :  { %4413 = vmatprep.subr.bf16.mxu1 %v5822_v21 }
 0x299   :  { %4415 = vmatpush3.bf16.msra.mxu1 %v5152_v23 }
 0x29a   :  { %4416 = vmatprep.subr.bf16.mxu1 %v5822_v21 }
 0x34f   :  { %v1373_v28 = vpop.f32.mrb[0].mxu1 }
 0x350   :  { %v1378_v30 = vmul.f32 0.03125, %v1373_v28  ;;  %v3539_v33 = vpop.f32.mrb[1].mxu1 }
 0x352   :  { %v5508_v34 = vsub.f32 %v4786_v22, %v1378_v30  ;;  %v5842_v22 = vld [vmem:[#allocation12_spill] sm:$0xff] }
 0x354   :  { %v1380_v20 = vmul.f32 %v5508_v34, %v5508_v34 }
 0x356   :  { %v5512_v37 = vand.u32 4294901760, %v1380_v20 }
 0x358   :  { %v1463_v50 = vsub.f32 %v1380_v20, %v5512_v37 }
 0x35a   :  { %v1464_v36 = vand.u32 4294901760, %v1463_v50 }
 0x35c   :  { %v1465_v29 = vsub.f32 %v1463_v50, %v1464_v36 }
 0x35e   :  { %v1466_v9 = vand.u32 4294901760, %v1465_v29 }
 0x360   :  { %3573 = vmatmul.mubr.f32.vlgmr.msra.gmra.mrb[2].mxu0 %v1466_v9 }
 0x361   :  { %4274 = vmatpush3.bf16.msra.mxu0 %v4890_v41  ;;  %3607 = vmatprep.mubr.msk.f32.mxu0 %vm4693_vm0, %v5821_v51  ;;  %v5843_v41 = vld [vmem:[#allocation13_spill] sm:$0xff] }
 0x362   :  { %4275 = vmatprep.subr.bf16.mxu0 %v5822_v21 }
 0x365   :  { %4277 = vmatpush3.bf16.msra.mxu0 %v4896_v56  ;;  %v5844_v56 = vld [vmem:[#allocation14_spill] sm:$0xff] }
 0x366   :  { %4278 = vmatprep.subr.bf16.mxu0 %v5822_v21 }
 0x369   :  { %4280 = vmatpush3.bf16.msra.mxu0 %v4903_v8  ;;  %v5845_v8 = vld [vmem:[#allocation15_spill] sm:$0xff] }
 0x36a   :  { %4281 = vmatprep.subr.bf16.mxu0 %v5822_v21 }
 0x36d   :  { %4283 = vmatpush3.bf16.msra.mxu0 %v4910_v16  ;;  %v5846_v16 = vld [vmem:[#allocation16_spill] sm:$0xff] }
 0x36e   :  { %4284 = vmatprep.subr.bf16.mxu0 %v5822_v21 }
 0x371   :  { %4286 = vmatpush3.bf16.msra.mxu0 %v4916_v17  ;;  %v5847_v17 = vld [vmem:[#allocation17_spill] sm:$0xff] }
 0x372   :  { %4287 = vmatprep.subr.bf16.mxu0 %v5822_v21 }
 0x375   :  { %4289 = vmatpush3.bf16.msra.mxu0 %v4922_v57  ;;  %v5848_v57 = vld [vmem:[#allocation18_spill] sm:$0xff] }
 0x376   :  { %4290 = vmatprep.subr.bf16.mxu0 %v5822_v21 }
 0x379   :  { %4292 = vmatpush3.bf16.msra.mxu0 %v4927_v58  ;;  %v5849_v58 = vld [vmem:[#allocation19_spill] sm:$0xff] }
 0x37a   :  { %4293 = vmatprep.subr.bf16.mxu0 %v5822_v21 }
 0x37d   :  { %4295 = vmatpush3.bf16.msra.mxu0 %v4931_v25  ;;  %v5850_v25 = vld [vmem:[#allocation20_spill] sm:$0xff] }
 0x37e   :  { %4296 = vmatprep.subr.bf16.mxu0 %v5822_v21 }
 0x380   :  { %3608 = vmatmul.mubr.f32.vlgmr.msra.gmra.mrb[2].mxu0 %v5512_v37 }
 0x381   :  { %4298 = vmatpush3.bf16.msra.mxu0 %v4937_v26  ;;  %3642 = vmatprep.mubr.msk.f32.mxu0 %vm4693_vm0, %v5821_v51  ;;  %v5851_v26 = vld [vmem:[#allocation21_spill] sm:$0xff] }
 0x382   :  { %4299 = vmatprep.subr.bf16.mxu0 %v5822_v21 }
 0x385   :  { %4301 = vmatpush3.bf16.msra.mxu0 %v4950_v15  ;;  %v5852_v15 = vld [vmem:[#allocation22_spill] sm:$0xff] }
 0x386   :  { %4302 = vmatprep.subr.bf16.mxu0 %v5822_v21 }
 0x389   :  { %4304 = vmatpush3.bf16.msra.mxu0 %v4974_v44  ;;  %v5854_v44 = vld [vmem:[#allocation24_spill] sm:$0xff] }
 0x38a   :  { %4305 = vmatprep.subr.bf16.mxu0 %v5822_v21 }
 0x38d   :  { %4307 = vmatpush3.bf16.msra.mxu0 %v4994_v55  ;;  %v5855_v55 = vld [vmem:[#allocation25_spill] sm:$0xff] }
 0x38e   :  { %4308 = vmatprep.subr.bf16.mxu0 %v5822_v21 }
 0x391   :  { %4310 = vmatpush3.bf16.msra.mxu0 %v5014_v60  ;;  %v5856_v60 = vld [vmem:[#allocation26_spill] sm:$0xff] }
 0x392   :  { %4311 = vmatprep.subr.bf16.mxu0 %v5822_v21 }
 0x395   :  { %4313 = vmatpush3.bf16.msra.mxu0 %v5034_v62  ;;  %v5857_v62 = vld [vmem:[#allocation27_spill] sm:$0xff] }
 0x396   :  { %4314 = vmatprep.subr.bf16.mxu0 %v5822_v21 }
 0x399   :  { %4316 = vmatpush3.bf16.msra.mxu0 %v5050_v63 }
 0x39a   :  { %4317 = vmatprep.subr.bf16.mxu0 %v5822_v21 }
 0x39d   :  { %4319 = vmatpush3.bf16.msra.mxu0 %v5064_v46  ;;  %v5853_v46 = vld [vmem:[#allocation23_spill] sm:$0xff] }
 0x39e   :  { %4320 = vmatprep.subr.bf16.mxu0 %v5822_v21 }
 0x3a0   :  { %3643 = vmatmul.mubr.f32.vlgmr.msra.gmra.mrb[2].mxu0 %v1463_v50 }
 0x3a1   :  { %4322 = vmatpush3.bf16.msra.mxu0 %v5842_v22  ;;  %3677 = vmatprep.mubr.msk.f32.mxu0 %vm4693_vm0, %v5821_v51 }
 0x3a2   :  { %4323 = vmatprep.subr.bf16.mxu0 %v5822_v21 }
 0x3a5   :  { %4325 = vmatpush3.bf16.msra.mxu0 %v5843_v41 }
 0x3a6   :  { %4326 = vmatprep.subr.bf16.mxu0 %v5822_v21 }
 0x3a9   :  { %4328 = vmatpush3.bf16.msra.mxu0 %v5844_v56 }
 0x3aa   :  { %4329 = vmatprep.subr.bf16.mxu0 %v5822_v21 }
 0x3ad   :  { %4331 = vmatpush3.bf16.msra.mxu0 %v5845_v8 }
 0x3ae   :  { %4332 = vmatprep.subr.bf16.mxu0 %v5822_v21 }
 0x3b1   :  { %4334 = vmatpush3.bf16.msra.mxu0 %v5846_v16 }
 0x3b2   :  { %4335 = vmatprep.subr.bf16.mxu0 %v5822_v21 }
 0x3b5   :  { %4337 = vmatpush3.bf16.msra.mxu0 %v5847_v17 }
 0x3b6   :  { %4338 = vmatprep.subr.bf16.mxu0 %v5822_v21 }
 0x3b9   :  { %4340 = vmatpush3.bf16.msra.mxu0 %v5848_v57 }
 0x3ba   :  { %4341 = vmatprep.subr.bf16.mxu0 %v5822_v21 }
 0x3bd   :  { %4343 = vmatpush3.bf16.msra.mxu0 %v5849_v58 }
 0x3be   :  { %4344 = vmatprep.subr.bf16.mxu0 %v5822_v21 }
 0x3c0   :  { %3678 = vmatmul.mubr.f32.vlgmr.msra.gmra.mrb[2].mxu0 %v1464_v36 }
 0x3c1   :  { %4346 = vmatpush3.bf16.msra.mxu0 %v5850_v25  ;;  %3712 = vmatprep.mubr.msk.f32.mxu0 %vm4693_vm0, %v5821_v51 }
 0x3c2   :  { %4347 = vmatprep.subr.bf16.mxu0 %v5822_v21 }
 0x3c5   :  { %4349 = vmatpush3.bf16.msra.mxu0 %v5851_v26 }
 0x3c6   :  { %4350 = vmatprep.subr.bf16.mxu0 %v5822_v21 }
 0x3c9   :  { %4352 = vmatpush3.bf16.msra.mxu0 %v5852_v15 }
 0x3ca   :  { %4353 = vmatprep.subr.bf16.mxu0 %v5822_v21 }
 0x3cd   :  { %4355 = vmatpush3.bf16.msra.mxu0 %v5853_v46 }
 0x3ce   :  { %4356 = vmatprep.subr.bf16.mxu0 %v5822_v21 }
 0x3d1   :  { %4358 = vmatpush3.bf16.msra.mxu0 %v5854_v44 }
 0x3d2   :  { %4359 = vmatprep.subr.bf16.mxu0 %v5822_v21 }
 0x3d5   :  { %4361 = vmatpush3.bf16.msra.mxu0 %v5855_v55 }
 0x3d6   :  { %4362 = vmatprep.subr.bf16.mxu0 %v5822_v21 }
 0x3d9   :  { %4364 = vmatpush3.bf16.msra.mxu0 %v5856_v60 }
 0x3da   :  { %4365 = vmatprep.subr.bf16.mxu0 %v5822_v21 }
 0x3dd   :  { %4367 = vmatpush3.bf16.msra.mxu0 %v5857_v62 }
 0x3de   :  { %4368 = vmatprep.subr.bf16.mxu0 %v5822_v21 }
 0x3e0   :  { %3713 = vmatmul.mubr.f32.vlgmr.msra.gmra.mrb[2].mxu0 %v5512_v37 }
 0x3e1   :  { %4370 = vmatpush3.bf16.msra.mxu0 %v5842_v22  ;;  %3747 = vmatprep.mubr.msk.f32.mxu0 %vm4693_vm0, %v5821_v51 }
 0x3e2   :  { %4371 = vmatprep.subr.bf16.mxu0 %v5822_v21 }
 0x3e5   :  { %4373 = vmatpush3.bf16.msra.mxu0 %v5843_v41 }
 0x3e6   :  { %4374 = vmatprep.subr.bf16.mxu0 %v5822_v21 }
 0x3e9   :  { %4376 = vmatpush3.bf16.msra.mxu0 %v5844_v56 }
 0x3ea   :  { %4377 = vmatprep.subr.bf16.mxu0 %v5822_v21 }
 0x3ed   :  { %4379 = vmatpush3.bf16.msra.mxu0 %v5845_v8 }
 0x3ee   :  { %4380 = vmatprep.subr.bf16.mxu0 %v5822_v21 }
 0x3f1   :  { %4382 = vmatpush3.bf16.msra.mxu0 %v5846_v16 }
 0x3f2   :  { %4383 = vmatprep.subr.bf16.mxu0 %v5822_v21 }
 0x3f5   :  { %4385 = vmatpush3.bf16.msra.mxu0 %v5847_v17 }
 0x3f6   :  { %4386 = vmatprep.subr.bf16.mxu0 %v5822_v21 }
 0x3f9   :  { %4388 = vmatpush3.bf16.msra.mxu0 %v5848_v57 }
 0x3fa   :  { %4389 = vmatprep.subr.bf16.mxu0 %v5822_v21 }
 0x3fd   :  { %4391 = vmatpush3.bf16.msra.mxu0 %v5849_v58 }
 0x400   :  { %3748 = vmatmul.mubr.f32.vlgmr.msra.gmra.mrb[2].mxu0 %v5512_v37 }
 0x4d3   :  { %v2018_v63 = vpop.f32.mrb[2].mxu0 }
 0x4d4   :  { %v5607_v31 = vand.u32 4294901760, %v2018_v63  ;;  %v3749_v49 = vpop.f32.mrb[3].mxu0 }
 0x4d6   :  { %v2104_v47 = vsub.f32 %v2018_v63, %v5607_v31 }
 0x4d8   :  { %v2105_v19 = vand.u32 4294901760, %v2104_v47 }
 0x4da   :  { %v2106_v39 = vsub.f32 %v2104_v47, %v2105_v19 }
 0x4dc   :  { %v2107_v14 = vand.u32 4294901760, %v2106_v39 }
 0x4de   :  { %3783 = vmatmul.mubr.f32.vlgmr.msra.gmra.mrb[2].mxu1 %v2107_v14 }
 0x4df   :  { %4418 = vmatpush3.bf16.msra.mxu1 %v5267_v5  ;;  %3817 = vmatprep.mubr.msk.f32.mxu1 %vm4693_vm0, %v5821_v51  ;;  %v5861_v5 = vld [vmem:[#allocation29_spill] sm:$0xff] }
 0x4e0   :  { %4419 = vmatprep.subr.bf16.mxu1 %v5822_v21 }
 0x4e3   :  { %4421 = vmatpush3.bf16.msra.mxu1 %v5279_v12  ;;  %v5858_v12 = vld [vmem:[#allocation30_spill] sm:$0xff] }
 0x4e4   :  { %4422 = vmatprep.subr.bf16.mxu1 %v5822_v21 }
 0x4e7   :  { %4424 = vmatpush3.bf16.msra.mxu1 %v5303_v42 }
 0x4e8   :  { %4425 = vmatprep.subr.bf16.mxu1 %v5822_v21 }
 0x4eb   :  { %4427 = vmatpush3.bf16.msra.mxu1 %v5315_v48 }
 0x4ec   :  { %4428 = vmatprep.subr.bf16.mxu1 %v5822_v21 }
 0x4ef   :  { %4430 = vmatpush3.bf16.msra.mxu1 %v5326_v11 }
 0x4f0   :  { %4431 = vmatprep.subr.bf16.mxu1 %v5822_v21 }
 0x4f3   :  { %4433 = vmatpush3.bf16.msra.mxu1 %v5330_v40 }
 0x4f4   :  { %4434 = vmatprep.subr.bf16.mxu1 %v5822_v21 }
 0x4f7   :  { %4436 = vmatpush3.bf16.msra.mxu1 %v5180_v35  ;;  %v5860_v35 = vld [vmem:[#allocation28_spill] sm:$0xff] }
 0x4f8   :  { %4437 = vmatprep.subr.bf16.mxu1 %v5822_v21 }
 0x4fb   :  { %4439 = vmatpush3.bf16.msra.mxu1 %v5182_v38  ;;  %v5859_v38 = vld [vmem:[#allocation31_spill] sm:$0xff] }
 0x4fc   :  { %4440 = vmatprep.subr.bf16.mxu1 %v5822_v21 }
 0x4fe   :  { %3818 = vmatmul.mubr.f32.vlgmr.msra.gmra.mrb[2].mxu1 %v5607_v31 }
 0x4ff   :  { %4442 = vmatpush3.bf16.msra.mxu1 %v5340_v59  ;;  %3852 = vmatprep.mubr.msk.f32.mxu1 %vm4693_vm0, %v5821_v51 }
 0x500   :  { %4443 = vmatprep.subr.bf16.mxu1 %v5822_v21 }
 0x503   :  { %4445 = vmatpush3.bf16.msra.mxu1 %v5347_v61 }
 0x504   :  { %4446 = vmatprep.subr.bf16.mxu1 %v5822_v21 }
 0x507   :  { %4448 = vmatpush3.bf16.msra.mxu1 %v5355_v10 }
 0x508   :  { %4449 = vmatprep.subr.bf16.mxu1 %v5822_v21 }
 0x50b   :  { %4451 = vmatpush3.bf16.msra.mxu1 %v5361_v32 }
 0x50c   :  { %4452 = vmatprep.subr.bf16.mxu1 %v5822_v21 }
 0x50f   :  { %4454 = vmatpush3.bf16.msra.mxu1 %v5858_v12 }
 0x510   :  { %4455 = vmatprep.subr.bf16.mxu1 %v5822_v21 }
 0x513   :  { %4457 = vmatpush3.bf16.msra.mxu1 %v5859_v38 }
 0x514   :  { %4458 = vmatprep.subr.bf16.mxu1 %v5822_v21 }
 0x517   :  { %4460 = vmatpush3.bf16.msra.mxu1 %v5860_v35 }
 0x518   :  { %4461 = vmatprep.subr.bf16.mxu1 %v5822_v21 }
 0x51b   :  { %4463 = vmatpush3.bf16.msra.mxu1 %v5861_v5 }
 0x51c   :  { %4464 = vmatprep.subr.bf16.mxu1 %v5822_v21 }
 0x51e   :  { %3853 = vmatmul.mubr.f32.vlgmr.msra.gmra.mrb[2].mxu1 %v2104_v47 }
 0x51f   :  { %4466 = vmatpush3.bf16.msra.mxu1 %v4969_v43  ;;  %3887 = vmatprep.mubr.msk.f32.mxu1 %vm4693_vm0, %v5821_v51 }
 0x520   :  { %4467 = vmatprep.subr.bf16.mxu1 %v5822_v21 }
 0x523   :  { %4469 = vmatpush3.bf16.msra.mxu1 %v4981_v53 }
 0x524   :  { %4470 = vmatprep.subr.bf16.mxu1 %v5822_v21 }
 0x527   :  { %4472 = vmatpush3.bf16.msra.mxu1 %v5001_v6 }
 0x528   :  { %4473 = vmatprep.subr.bf16.mxu1 %v5822_v21 }
 0x52b   :  { %4475 = vmatpush3.bf16.msra.mxu1 %v5021_v54 }
 0x52c   :  { %4476 = vmatprep.subr.bf16.mxu1 %v5822_v21 }
 0x52f   :  { %4478 = vmatpush3.bf16.msra.mxu1 %v5041_v7 }
 0x530   :  { %4479 = vmatprep.subr.bf16.mxu1 %v5822_v21 }
 0x533   :  { %4481 = vmatpush3.bf16.msra.mxu1 %v5057_v2 }
 0x534   :  { %4482 = vmatprep.subr.bf16.mxu1 %v5822_v21 }
 0x537   :  { %4484 = vmatpush3.bf16.msra.mxu1 %v5148_v4 }
 0x538   :  { %4485 = vmatprep.subr.bf16.mxu1 %v5822_v21 }
 0x53b   :  { %4487 = vmatpush3.bf16.msra.mxu1 %v5152_v23 }
 0x53c   :  { %4488 = vmatprep.subr.bf16.mxu1 %v5822_v21 }
 0x53e   :  { %3888 = vmatmul.mubr.f32.vlgmr.msra.gmra.mrb[2].mxu1 %v2105_v19 }
 0x53f   :  { %4490 = vmatpush3.bf16.msra.mxu1 %v5404_v18  ;;  %3922 = vmatprep.mubr.msk.f32.mxu1 %vm4693_vm0, %v5821_v51  ;;  %v2711_v18 = vld [vmem:[%s5726_s2] ss:$0 sm:$0xff] }
 0x540   :  { %4491 = vmatprep.subr.bf16.mxu1 %v5822_v21 }
 0x543   :  { %4493 = vmatpush3.bf16.msra.mxu1 %v5414_v24 }
 0x544   :  { %4494 = vmatprep.subr.bf16.mxu1 %v5822_v21 }
 0x547   :  { %4496 = vmatpush3.bf16.msra.mxu1 %v5424_v0 }
 0x548   :  { %4497 = vmatprep.subr.bf16.mxu1 %v5822_v21 }
 0x54b   :  { %4499 = vmatpush3.bf16.msra.mxu1 %v5432_v1 }
 0x54c   :  { %4500 = vmatprep.subr.bf16.mxu1 %v5822_v21 }
 0x54f   :  { %4502 = vmatpush3.bf16.msra.mxu1 %v5440_v3 }
 0x550   :  { %4503 = vmatprep.subr.bf16.mxu1 %v5822_v21 }
 0x553   :  { %4505 = vmatpush3.bf16.msra.mxu1 %v5448_v13 }
 0x554   :  { %4506 = vmatprep.subr.bf16.mxu1 %v5822_v21 }
 0x557   :  { %4508 = vmatpush3.bf16.msra.mxu1 %v5456_v27 }
 0x558   :  { %4509 = vmatprep.subr.bf16.mxu1 %v5822_v21 }
 0x55b   :  { %4511 = vmatpush3.bf16.msra.mxu1 %v5464_v45 }
 0x55c   :  { %4512 = vmatprep.subr.bf16.mxu1 %v5822_v21 }
 0x55e   :  { %3923 = vmatmul.mubr.f32.vlgmr.msra.gmra.mrb[2].mxu1 %v5607_v31 }
 0x55f   :  { %4514 = vmatpush3.bf16.msra.mxu1 %v4969_v43  ;;  %3957 = vmatprep.mubr.msk.f32.mxu1 %vm4693_vm0, %v5821_v51 }
 0x560   :  { %4515 = vmatprep.subr.bf16.mxu1 %v5822_v21 }
 0x563   :  { %4517 = vmatpush3.bf16.msra.mxu1 %v4981_v53 }
 0x564   :  { %4518 = vmatprep.subr.bf16.mxu1 %v5822_v21 }
 0x567   :  { %4520 = vmatpush3.bf16.msra.mxu1 %v5001_v6 }
 0x568   :  { %4521 = vmatprep.subr.bf16.mxu1 %v5822_v21 }
 0x56b   :  { %4523 = vmatpush3.bf16.msra.mxu1 %v5021_v54 }
 0x56c   :  { %4524 = vmatprep.subr.bf16.mxu1 %v5822_v21 }
 0x56f   :  { %4526 = vmatpush3.bf16.msra.mxu1 %v5041_v7 }
 0x570   :  { %4527 = vmatprep.subr.bf16.mxu1 %v5822_v21 }
 0x573   :  { %4529 = vmatpush3.bf16.msra.mxu1 %v5057_v2 }
 0x574   :  { %4530 = vmatprep.subr.bf16.mxu1 %v5822_v21 }
 0x577   :  { %4532 = vmatpush3.bf16.msra.mxu1 %v5148_v4 }
 0x578   :  { %4533 = vmatprep.subr.bf16.mxu1 %v5822_v21 }
 0x57b   :  { %4535 = vmatpush3.bf16.msra.mxu1 %v5152_v23  ;;  %v2710_v23 = vld [vmem:[%s5725_s1] ss:$0 sm:$0xff] }
 0x57e   :  { %3958 = vmatmul.mubr.f32.vlgmr.msra.gmra.mrb[2].mxu1 %v5607_v31 }
 0x651   :  { %v2659_v43 = vpop.f32.mrb[2].mxu1 }
 0x652   :  { %v2664_v53 = vmul.f32 0.032258064, %v2659_v43  ;;  %v3959_v54 = vpop.f32.mrb[3].mxu1 }
 0x654   :  { %4587 = vrsqrt.f32 %v2664_v53  ;;  %vm2667_vm1 = vcmp.eq.f32.partialorder %v2664_v53, inf  ;;  %v2670_v11 = vand.u32 2147483648, %v2664_v53  ;;  %vm2669_vm2 = vcmp.eq.f32.partialorder %v2664_v53, 0.0 }
 0x65e   :  { %v4588_v6 = vpop.eup %4587 }
 0x65f   :  { %v2666_v7 = vmul.f32 %v4588_v6, %v2664_v53 }
 0x661   :  { %v2668_v51 = vsel %vm2667_vm1, %v2664_v53, %v2666_v7 }
 0x662   :  { %v2671_v2 = vsel %vm2669_vm2, %v2670_v11, %v2668_v51 }
 0x663   :  { %v2672_v42 = vadd.f32 1e-06, %v2671_v2 }
 0x665   :  { %4589 = vrcp.f32 %v2672_v42 }
 0x66f   :  { %v4590_v4 = vpop.eup %4589 }
 0x670   :  { %v2675_v21 = vmul.f32 %v4590_v4, %v5508_v34 }
 0x672   :  { %v2682_v48 = vmul.f32 %v2710_v23, %v2675_v21 }
 0x674   :  { %v2690_v40 = vadd.f32 %v2711_v18, %v2682_v48 }
 0x676   :  { %2691 = vst [vmem:[#allocation8] sm:$0xff] %v2690_v40 }
 0x677   :  { %2696 = vsyncadd [#allocation4], 64  ;;  %s4695_s10 = smov [#allocation8]  }
 0x678   :  { %s2697_s11 = sshll.u32 %s4695_s10, 4  ;;  %s2698_s11 = int_to_ptr.vmem [resolvable:$true] %s2697_s11 }
 0x679   :  { %s4657_s12 = scalar_lea.vmem %s2698_s11, 64  ;;  %s4661_s13 = scalar_lea.vmem %s2698_s11, 128 }
 0x67a   :  { %p4658_p10 = scmp.ne.s32.totalorder %s2698_s11, %s4657_s12  ;;  %p4662_p11 = scmp.lt.s32.totalorder %s2698_s11, %s2698_s11 }
 0x67b   :  { %p4663_p12 = scmp.lt.s32.totalorder %s4661_s13, %s4657_s12 }
 0x67d   :  { %p4664_p13 = por %p4663_p12, %p4662_p11 }
 0x67f   :  { %p4665_p0 = pnand %p4664_p13, %p4658_p10 }
 0x681   :  { %4668 = shalt.err (!%p4665_p0)
}
 0x682   :  { %s4669_s15 = scalar_lea.hbm %s5729_s5, 64 }
 0x683   :  { %p4670_p1 = scmp.ne.s32.totalorder %s5729_s5, %s4669_s15  ;;  %p4673_p2 = scmp.lt.u32.totalorder %s4669_s15, %s5729_s5 }
 0x685   :  { %p4675_p3 = pnand %p4673_p2, %p4670_p1 }
 0x687   :  { %4678 = shalt.err (!%p4675_p3)
}
 0x688   :  { %2703 = dma.vmem_to_hbm [thread:$0]  %s2698_s11, 64, %s5729_s5, [#allocation4], %s4689_s17, %s4689_s17, %s4690_s18  }
 0x689   :  { %4683 = dma.done.wait [#allocation4], 128  }
 0x68a   :  { %4684 = vsyncadd [#allocation4], 4294967168 }
 0x68b   :  { %2707 = vsyncpa [#allocation3], 1 }
 0x68c   :  { %2708 = vsyncpa [#allocation6], 1 }
 0x68d   :  { %2709 = vsyncpa [#allocation4], 1 }

</bundles_post_ra>
